<compile_context>
chip_gen: v7x
topology: tpu7x:2x2x1
jax: 0.10.0
libtpu: 0.0.40
codegen_flags: <defaults>
</compile_context>

<pallas_src>
import math
from functools import partial

import jax
import jax.numpy as jnp
from jax import lax
from jax.experimental import pallas as pl
from jax.experimental.pallas import tpu as pltpu


_VMEM_LIMIT = 32 * 1024 * 1024   # explicit scoped-VMEM cap; safe on v5e/v6e/v7x


def _round_up(x: int, m: int) -> int:
    return (x + m - 1) // m * m


# --------------------------------------------------------------------------
# Fused path: z fully resident in VMEM, everything in one kernel.
# z_ref: (M, N, D) in z's dtype; w1_ref: (D, H) in z's dtype; b1/w2: (1, H) f32.
# --------------------------------------------------------------------------
def _fused_kernel(z_ref, w1_ref, b1_ref, w2_ref, out_ref, *, num_meta, n_nodes):
    w1 = w1_ref[...]
    b1 = b1_ref[...]
    w2 = w2_ref[...]
    inv_n = 1.0 / n_nodes

    # Per-meta-path attention scores (each a (1, 1) f32 value).
    scores = []
    for m in range(num_meta):                              # static loop, M is small
        zm = z_ref[m]                                      # (N, D) leading-dim view
        h = jnp.tanh(jnp.dot(zm, w1, preferred_element_type=jnp.float32) + b1)
        mean_h = jnp.sum(h, axis=0, keepdims=True) * inv_n           # (1, H)
        # mean_n(tanh(.) @ w2) == (mean_n tanh(.)) . w2  -> VPU mul + lane reduce
        scores.append(jnp.sum(mean_h * w2, axis=-1, keepdims=True))  # (1, 1)

    # Exact softmax over the M (static) scores.
    s_max = scores[0]
    for s in scores[1:]:
        s_max = jnp.maximum(s_max, s)
    exps = [jnp.exp(s - s_max) for s in scores]
    denom = exps[0]
    for e in exps[1:]:
        denom = denom + e

    # Beta-weighted combine from the same VMEM-resident z.
    acc = z_ref[0].astype(jnp.float32) * (exps[0] / denom)
    for m in range(1, num_meta):
        acc = acc + z_ref[m].astype(jnp.float32) * (exps[m] / denom)
    out_ref[...] = acc.astype(out_ref.dtype)


# --------------------------------------------------------------------------
# Tiled path, pass 1: accumulate sum_n tanh(z @ W1 + b1) per meta-path -> beta.
# --------------------------------------------------------------------------
def _beta_kernel(z_ref, w1_ref, b1_ref, w2_ref, beta_ref, acc_ref,
                 *, num_meta, tile_n, n_valid, hidden):
    i = pl.program_id(0)

    @pl.when(i == 0)
    def _init():
        acc_ref[...] = jnp.zeros_like(acc_ref)

    zb = z_ref[...]                                        # (M, tile_n, D), z's dtype
    d = zb.shape[-1]
    # Free leading-dim collapse (tile_n % 8 == 0) -> one long MXU stream per tile.
    z2d = zb.reshape(num_meta * tile_n, d)
    h = jnp.tanh(jnp.dot(z2d, w1_ref[...], preferred_element_type=jnp.float32)
                 + b1_ref[...])                            # (M*tile_n, H) f32
    h = h.reshape(num_meta, tile_n, hidden)

    if n_valid % tile_n != 0:
        # Ragged tail: out-of-bounds rows hold unspecified data -> hard-select to 0
        # (jnp.where, not multiply, so NaN/Inf garbage cannot poison the sum).
        row = lax.broadcasted_iota(jnp.int32, (tile_n, 1), 0)
        valid = (i * tile_n + row) < n_valid               # (tile_n, 1)
        h = jnp.where(valid[None, :, :], h, 0.0)

    acc_ref[...] += jnp.sum(h, axis=1)                     # (M, H)

    @pl.when(i == pl.num_programs(0) - 1)
    def _finalize():
        mean_h = acc_ref[...] * (1.0 / n_valid)                       # (M, H)
        w = jnp.sum(mean_h * w2_ref[...], axis=-1, keepdims=True)     # (M, 1)
        w_max = jnp.max(w, axis=0, keepdims=True)
        e = jnp.exp(w - w_max)
        beta_ref[...] = e / jnp.sum(e, axis=0, keepdims=True)         # exact: M values


# --------------------------------------------------------------------------
# Tiled path, pass 2: out[n, :] = sum_m beta[m] * z[m, n, :]   (parallel node tiles)
# --------------------------------------------------------------------------
def _combine_kernel(beta_ref, z_ref, out_ref, *, num_meta):
    acc = z_ref[0].astype(jnp.float32) * beta_ref[0, 0]    # beta scalars live in SMEM
    for m in range(1, num_meta):
        acc = acc + z_ref[m].astype(jnp.float32) * beta_ref[m, 0]
    out_ref[...] = acc.astype(out_ref.dtype)               # single lane-dense store


# --------------------------------------------------------------------------
# Wrapper: matches the PyTorch module's forward.
#   z: (N, M, D)  (or (M, N, D) with z_is_meta_major=True)
#   W1: (D, H), b1: (H,) or (1, H), w2: (H, 1)
# --------------------------------------------------------------------------
def semantic_attention(z, W1, b1, w2, *, tile_n=1024,
                       fuse_bytes_limit=8 * 1024 * 1024, z_is_meta_major=False):
    if z_is_meta_major:
        M, N, D = z.shape
        z_t = z
    else:
        N, M, D = z.shape
        # Meta-path-major layout: per-meta-path slices become cheap leading-dim views
        # with native (8, 128) tiling inside the kernels.  This is the one remaining
        # wrapper-level HBM round trip (see TODO at top of file).
        z_t = jnp.transpose(z, (1, 0, 2))
    H = W1.shape[1]

    w1_c = W1.astype(z_t.dtype)                            # MXU operand in z's dtype
    b1_row = jnp.reshape(b1, (1, H)).astype(jnp.float32)
    w2_row = jnp.reshape(w2, (1, H)).astype(jnp.float32)
    out_dtype = z_t.dtype

    # ---------- fused single-kernel path: z read from HBM exactly once ----------
    if z_t.size * z_t.dtype.itemsize <= fuse_bytes_limit:
        return pl.pallas_call(
            partial(_fused_kernel, num_meta=M, n_nodes=N),
            out_shape=jax.ShapeDtypeStruct((N, D), out_dtype),
            compiler_params=pltpu.CompilerParams(vmem_limit_bytes=_VMEM_LIMIT),
        )(z_t, w1_c, b1_row, w2_row)

    # ---------- tiled two-pass path (large N) ----------
    tile_n = _round_up(min(tile_n, N), 8)                  # always a multiple of 8
    grid = (pl.cdiv(N, tile_n),)

    cp_seq = pltpu.CompilerParams(dimension_semantics=("arbitrary",),
                                  vmem_limit_bytes=_VMEM_LIMIT)
    cp_par = pltpu.CompilerParams(dimension_semantics=("parallel",),
                                  vmem_limit_bytes=_VMEM_LIMIT)

    beta = pl.pallas_call(
        partial(_beta_kernel, num_meta=M, tile_n=tile_n, n_valid=N, hidden=H),
        out_shape=jax.ShapeDtypeStruct((M, 1), jnp.float32),
        grid=grid,
        in_specs=[
            pl.BlockSpec((M, tile_n, D), lambda i: (0, i, 0)),   # streamed z tiles
            pl.BlockSpec((D, H), lambda i: (0, 0)),              # resident weights
            pl.BlockSpec((1, H), lambda i: (0, 0)),
            pl.BlockSpec((1, H), lambda i: (0, 0)),
        ],
        out_specs=pl.BlockSpec((M, 1), lambda i: (0, 0)),        # resident; written at end
        scratch_shapes=[pltpu.VMEM((M, H), jnp.float32)],
        compiler_params=cp_seq,
    )(z_t, w1_c, b1_row, w2_row)

    out = pl.pallas_call(
        partial(_combine_kernel, num_meta=M),
        out_shape=jax.ShapeDtypeStruct((N, D), out_dtype),       # no pad, no out[:N]
        grid=grid,
        in_specs=[
            pl.BlockSpec(memory_space=pltpu.MemorySpace.SMEM),   # beta scalars
            pl.BlockSpec((M, tile_n, D), lambda i: (0, i, 0),
                         pipeline_mode=pl.Buffered(3)),          # cover DMA-issue gaps
        ],
        out_specs=pl.BlockSpec((tile_n, D), lambda i: (i, 0)),   # lane-dense output
        compiler_params=cp_par,
    )(beta, z_t)
    return out


# --------------------------------------------------------------------------
# Pure-JAX reference (mirrors the PyTorch forward exactly).
# --------------------------------------------------------------------------
def semantic_attention_ref(z, W1, b1, w2):
    h1 = jnp.tanh(jnp.einsum("nmd,dh->nmh", z, W1) + jnp.reshape(b1, (1, 1, -1)))
    s = jnp.einsum("nmh,ho->nmo", h1, w2)            # (N, M, 1)
    w = jnp.mean(s, axis=0)                          # (M, 1)
    beta = jax.nn.softmax(w, axis=0)                 # (M, 1)
    return jnp.sum(beta[None, :, :] * z, axis=1)     # (N, D)


if __name__ == "__main__":
    # Small config consistent with HAN usage: z = stacked per-meta-path embeddings.
    M = 3          # meta-paths
    N = 250        # nodes (deliberately not a multiple of the tile -> exercises masking)
    D = 128        # in_size (H*F of the preceding GAT layer)
    H = 128        # SemanticAttention hidden_size (module default)

    key = jax.random.PRNGKey(0)
    k1, k2, k3, k4 = jax.random.split(key, 4)
    z = jax.random.normal(k1, (N, M, D), jnp.float32)
    W1 = jax.random.normal(k2, (D, H), jnp.float32) * (1.0 / math.sqrt(D))
    b1 = jax.random.normal(k3, (H,), jnp.float32) * 0.1
    w2 = jax.random.normal(k4, (H, 1), jnp.float32) * (1.0 / math.sqrt(H))

    ref = semantic_attention_ref(z, W1, b1, w2)

    # Fused single-kernel path (z fits comfortably in VMEM).
    out_fused = jax.block_until_ready(semantic_attention(z, W1, b1, w2))
    # Tiled two-pass path (forced), exercising grid accumulation + ragged-tail masking.
    out_tiled = jax.block_until_ready(
        semantic_attention(z, W1, b1, w2, tile_n=64, fuse_bytes_limit=0))

    for name, out in (("fused", out_fused), ("tiled", out_tiled)):
        assert out.shape == (N, D), name
        assert bool(jnp.all(jnp.isfinite(out))), name
        max_err = float(jnp.max(jnp.abs(out - ref)))
        assert max_err < 2e-2, f"{name}: max abs err vs reference: {max_err}"
    print("KERNEL_OK")
</pallas_src>

<mosaic_0001>
module attributes {stable_mosaic.version = 11 : i64} {
  func.func @_fused_kernel(%arg0: memref<3x250x128xf32, #tpu.memory_space<vmem>>, %arg1: memref<128x128xf32, #tpu.memory_space<vmem>>, %arg2: memref<1x128xf32, #tpu.memory_space<vmem>>, %arg3: memref<1x128xf32, #tpu.memory_space<vmem>>, %arg4: memref<250x128xf32, #tpu.memory_space<vmem>>) attributes {dimension_semantics = [], scalar_prefetch = 0 : i64, scratch_operands = 0 : i64, tpu.core_type = #tpu.core_type<tc>} {
    %c0 = arith.constant 0 : index
    %c0_0 = arith.constant 0 : index
    %0 = vector.load %arg1[%c0, %c0_0] : memref<128x128xf32, #tpu.memory_space<vmem>>, vector<128x128xf32>
    %c0_1 = arith.constant 0 : index
    %c0_2 = arith.constant 0 : index
    %1 = vector.load %arg2[%c0_1, %c0_2] : memref<1x128xf32, #tpu.memory_space<vmem>>, vector<1x128xf32>
    %c0_3 = arith.constant 0 : index
    %c0_4 = arith.constant 0 : index
    %2 = vector.load %arg3[%c0_3, %c0_4] : memref<1x128xf32, #tpu.memory_space<vmem>>, vector<1x128xf32>
    %c0_5 = arith.constant 0 : index
    %c0_6 = arith.constant 0 : index
    %c0_7 = arith.constant 0 : index
    %3 = vector.load %arg0[%c0_5, %c0_6, %c0_7] : memref<3x250x128xf32, #tpu.memory_space<vmem>>, vector<1x250x128xf32>
    %4 = vector.shape_cast %3 : vector<1x250x128xf32> to vector<250x128xf32>
    %cst = arith.constant dense<0.000000e+00> : vector<250x128xf32>
    %5 = tpu.matmul %4, %0, %cst {dimension_numbers = #tpu.dot_dimension_numbers<[1], [0], [0], [1], [0, 0, 1, 1], [], []>} : vector<250x128xf32>, vector<128x128xf32>, vector<250x128xf32> -> vector<250x128xf32>
    %6 = vector.broadcast %1 : vector<1x128xf32> to vector<250x128xf32>
    %7 = arith.addf %5, %6 : vector<250x128xf32>
    %8 = math.tanh %7 : vector<250x128xf32>
    %cst_8 = arith.constant dense<0.000000e+00> : vector<128xf32>
    %9 = vector.multi_reduction <add>, %8, %cst_8 [0] : vector<250x128xf32> to vector<128xf32>
    %10 = vector.shape_cast %9 : vector<128xf32> to vector<1x128xf32>
    %cst_9 = arith.constant 4.000000e-03 : f32
    %11 = vector.broadcast %cst_9 : f32 to vector<1x128xf32>
    %12 = arith.mulf %10, %11 : vector<1x128xf32>
    %13 = arith.mulf %12, %2 : vector<1x128xf32>
    %cst_10 = arith.constant dense<0.000000e+00> : vector<1xf32>
    %14 = vector.multi_reduction <add>, %13, %cst_10 [1] : vector<1x128xf32> to vector<1xf32>
    %15 = vector.shape_cast %14 : vector<1xf32> to vector<1x1xf32>
    %c1 = arith.constant 1 : index
    %c0_11 = arith.constant 0 : index
    %c0_12 = arith.constant 0 : index
    %16 = vector.load %arg0[%c1, %c0_11, %c0_12] : memref<3x250x128xf32, #tpu.memory_space<vmem>>, vector<1x250x128xf32>
    %17 = vector.shape_cast %16 : vector<1x250x128xf32> to vector<250x128xf32>
    %cst_13 = arith.constant dense<0.000000e+00> : vector<250x128xf32>
    %18 = tpu.matmul %17, %0, %cst_13 {dimension_numbers = #tpu.dot_dimension_numbers<[1], [0], [0], [1], [0, 0, 1, 1], [], []>} : vector<250x128xf32>, vector<128x128xf32>, vector<250x128xf32> -> vector<250x128xf32>
    %19 = vector.broadcast %1 : vector<1x128xf32> to vector<250x128xf32>
    %20 = arith.addf %18, %19 : vector<250x128xf32>
    %21 = math.tanh %20 : vector<250x128xf32>
    %cst_14 = arith.constant dense<0.000000e+00> : vector<128xf32>
    %22 = vector.multi_reduction <add>, %21, %cst_14 [0] : vector<250x128xf32> to vector<128xf32>
    %23 = vector.shape_cast %22 : vector<128xf32> to vector<1x128xf32>
    %cst_15 = arith.constant 4.000000e-03 : f32
    %24 = vector.broadcast %cst_15 : f32 to vector<1x128xf32>
    %25 = arith.mulf %23, %24 : vector<1x128xf32>
    %26 = arith.mulf %25, %2 : vector<1x128xf32>
    %cst_16 = arith.constant dense<0.000000e+00> : vector<1xf32>
    %27 = vector.multi_reduction <add>, %26, %cst_16 [1] : vector<1x128xf32> to vector<1xf32>
    %28 = vector.shape_cast %27 : vector<1xf32> to vector<1x1xf32>
    %c2 = arith.constant 2 : index
    %c0_17 = arith.constant 0 : index
    %c0_18 = arith.constant 0 : index
    %29 = vector.load %arg0[%c2, %c0_17, %c0_18] : memref<3x250x128xf32, #tpu.memory_space<vmem>>, vector<1x250x128xf32>
    %30 = vector.shape_cast %29 : vector<1x250x128xf32> to vector<250x128xf32>
    %cst_19 = arith.constant dense<0.000000e+00> : vector<250x128xf32>
    %31 = tpu.matmul %30, %0, %cst_19 {dimension_numbers = #tpu.dot_dimension_numbers<[1], [0], [0], [1], [0, 0, 1, 1], [], []>} : vector<250x128xf32>, vector<128x128xf32>, vector<250x128xf32> -> vector<250x128xf32>
    %32 = vector.broadcast %1 : vector<1x128xf32> to vector<250x128xf32>
    %33 = arith.addf %31, %32 : vector<250x128xf32>
    %34 = math.tanh %33 : vector<250x128xf32>
    %cst_20 = arith.constant dense<0.000000e+00> : vector<128xf32>
    %35 = vector.multi_reduction <add>, %34, %cst_20 [0] : vector<250x128xf32> to vector<128xf32>
    %36 = vector.shape_cast %35 : vector<128xf32> to vector<1x128xf32>
    %cst_21 = arith.constant 4.000000e-03 : f32
    %37 = vector.broadcast %cst_21 : f32 to vector<1x128xf32>
    %38 = arith.mulf %36, %37 : vector<1x128xf32>
    %39 = arith.mulf %38, %2 : vector<1x128xf32>
    %cst_22 = arith.constant dense<0.000000e+00> : vector<1xf32>
    %40 = vector.multi_reduction <add>, %39, %cst_22 [1] : vector<1x128xf32> to vector<1xf32>
    %41 = vector.shape_cast %40 : vector<1xf32> to vector<1x1xf32>
    %42 = arith.maximumf %15, %28 : vector<1x1xf32>
    %43 = arith.maximumf %42, %41 : vector<1x1xf32>
    %44 = arith.subf %15, %43 : vector<1x1xf32>
    %45 = math.exp %44 : vector<1x1xf32>
    %46 = arith.subf %28, %43 : vector<1x1xf32>
    %47 = math.exp %46 : vector<1x1xf32>
    %48 = arith.subf %41, %43 : vector<1x1xf32>
    %49 = math.exp %48 : vector<1x1xf32>
    %50 = arith.addf %45, %47 : vector<1x1xf32>
    %51 = arith.addf %50, %49 : vector<1x1xf32>
    %c0_23 = arith.constant 0 : index
    %c0_24 = arith.constant 0 : index
    %c0_25 = arith.constant 0 : index
    %52 = vector.load %arg0[%c0_23, %c0_24, %c0_25] : memref<3x250x128xf32, #tpu.memory_space<vmem>>, vector<1x250x128xf32>
    %53 = vector.shape_cast %52 : vector<1x250x128xf32> to vector<250x128xf32>
    %54 = arith.divf %45, %51 : vector<1x1xf32>
    %55 = vector.broadcast %54 : vector<1x1xf32> to vector<250x128xf32>
    %56 = arith.mulf %53, %55 : vector<250x128xf32>
    %c1_26 = arith.constant 1 : index
    %c0_27 = arith.constant 0 : index
    %c0_28 = arith.constant 0 : index
    %57 = vector.load %arg0[%c1_26, %c0_27, %c0_28] : memref<3x250x128xf32, #tpu.memory_space<vmem>>, vector<1x250x128xf32>
    %58 = vector.shape_cast %57 : vector<1x250x128xf32> to vector<250x128xf32>
    %59 = arith.divf %47, %51 : vector<1x1xf32>
    %60 = vector.broadcast %59 : vector<1x1xf32> to vector<250x128xf32>
    %61 = arith.mulf %58, %60 : vector<250x128xf32>
    %62 = arith.addf %56, %61 : vector<250x128xf32>
    %c2_29 = arith.constant 2 : index
    %c0_30 = arith.constant 0 : index
    %c0_31 = arith.constant 0 : index
    %63 = vector.load %arg0[%c2_29, %c0_30, %c0_31] : memref<3x250x128xf32, #tpu.memory_space<vmem>>, vector<1x250x128xf32>
    %64 = vector.shape_cast %63 : vector<1x250x128xf32> to vector<250x128xf32>
    %65 = arith.divf %49, %51 : vector<1x1xf32>
    %66 = vector.broadcast %65 : vector<1x1xf32> to vector<250x128xf32>
    %67 = arith.mulf %64, %66 : vector<250x128xf32>
    %68 = arith.addf %62, %67 : vector<250x128xf32>
    %c0_32 = arith.constant 0 : index
    %c0_33 = arith.constant 0 : index
    %69 = vector.load %arg4[%c0_32, %c0_33] : memref<250x128xf32, #tpu.memory_space<vmem>>, vector<250x128xf32>
    tpu.vector_store %arg4[%c0_32, %c0_33], %68 {strides = array<i32>} : memref<250x128xf32, #tpu.memory_space<vmem>>, vector<250x128xf32>,
    return
  }
}

</mosaic_0001>

<bundles_post_ra>
// kernel: tpu_custom_call.1
= control target key start
LH: loop header
LB: loop body
LE: loop exit
PB: predicated region body
PF: predicated region fallthrough
CT: control target
= control target key end

     0   :  { %9 = vsyncpa [#allocation3], 0  ;;  %s2882_s0 = inlined_call_operand.hbm [shape: f32[3,250,128], index: 0, kind: input, shape index: {}]   ;;  %s2883_s1 = inlined_call_operand.hbm [shape: f32[128,128], index: 1, kind: input, shape index: {}]   ;;  %s2884_s2 = inlined_call_operand.vmem [shape: f32[1,128], index: 2, kind: input, shape index: {}]   ;;  %s2885_s3 = inlined_call_operand.vmem [shape: f32[1,128], index: 3, kind: input, shape index: {}]   ;;  %s2886_s4 = inlined_call_operand.hbm [shape: f32[250,128], index: 4, kind: output, shape index: {}]  }
   0x1   :  { %10 = vsyncpa [#allocation6], 0 }
   0x2   :  { %11 = vsyncpa [#allocation4], 0  ;;  %s2179_s15 = smov [#allocation2]   ;;  %s2107_s19 = scalar_lea.hbm %s2882_s0, 12288 }
   0x3   :  { %s17_s16 = sshll.u32 %s2179_s15, 4  ;;  %p2108_p0 = scmp.ne.s32.totalorder %s2882_s0, %s2107_s19  ;;  %s18_s16 = int_to_ptr.vmem [resolvable:$true] %s17_s16 }
   0x4   :  { %p2111_p1 = scmp.lt.u32.totalorder %s2107_s19, %s2882_s0 }
   0x6   :  { %p2113_p2 = pnand %p2111_p1, %p2108_p0 }
   0x8   :  { %2116 = shalt.err (!%p2113_p2)
}
   0x9   :  { %s2117_s24 = scalar_lea.vmem %s18_s16, 12288  ;;  %p2122_p4 = scmp.lt.s32.totalorder %s18_s16, %s18_s16 }
   0xa   :  { %p2118_p3 = scmp.ne.s32.totalorder %s18_s16, %s2117_s24  ;;  %p2123_p5 = scmp.lt.s32.totalorder %s2117_s24, %s2117_s24 }
   0xc   :  { %p2124_p6 = por %p2123_p5, %p2122_p4 }
   0xe   :  { %p2125_p7 = pnand %p2124_p6, %p2118_p3 }
  0x10   :  { %2128 = shalt.err (!%p2125_p7)
}
  0x11   :  { %s2180_s25 = smov 128   ;;  %s2181_s26 = smov 8  }
  0x12   :  { %23 = dma.hbm_to_vmem [thread:$0]  %s2882_s0, 12288, %s18_s16, [#allocation3], %s2180_s25, %s2180_s25, %s2181_s26  }
  0x13   :  { %s2182_s29 = smov [#allocation5]   ;;  %s2129_s7 = scalar_lea.hbm %s2883_s1, 2048 }
  0x14   :  { %s29_s30 = sshll.u32 %s2182_s29, 4  ;;  %p2130_p8 = scmp.ne.s32.totalorder %s2883_s1, %s2129_s7  ;;  %s30_s30 = int_to_ptr.vmem [resolvable:$true] %s29_s30 }
  0x15   :  { %p2133_p9 = scmp.lt.u32.totalorder %s2129_s7, %s2883_s1 }
  0x17   :  { %p2135_p10 = pnand %p2133_p9, %p2130_p8 }
  0x19   :  { %2138 = shalt.err (!%p2135_p10)
}
  0x1a   :  { %s2139_s12 = scalar_lea.vmem %s30_s30, 2048  ;;  %p2144_p12 = scmp.lt.s32.totalorder %s30_s30, %s30_s30 }
  0x1b   :  { %p2140_p11 = scmp.ne.s32.totalorder %s30_s30, %s2139_s12  ;;  %p2145_p13 = scmp.lt.s32.totalorder %s2139_s12, %s2139_s12 }
  0x1d   :  { %p2146_p0 = por %p2145_p13, %p2144_p12 }
  0x1f   :  { %p2147_p1 = pnand %p2146_p0, %p2140_p11 }
  0x21   :  { %2150 = shalt.err (!%p2147_p1)
}
  0x22   :  { %35 = dma.hbm_to_vmem [thread:$0]  %s2883_s1, 2048, %s30_s30, [#allocation6], %s2180_s25, %s2180_s25, %s2181_s26  }
  0x23   :  { %2173 = dma.done.wait [#allocation3], 12288  }
  0x24   :  { %2174 = vsyncadd [#allocation3], 4294955008 }
  0x25   :  { %2175 = dma.done.wait [#allocation6], 2048  }
  0x26   :  { %2176 = vsyncadd [#allocation6], 4294965248  ;;  %v46_v0 = vld [vmem:[#allocation5] sm:$0xff]  ;;  %v47_v1 = vld [vmem:[#allocation5 + $0x8] sm:$0xff]  ;;  %vm389_vm0 = vcmask 1041408   ;;  %vm400_vm1 = vcmask 1040384  }
  0x27   :  { %v48_v2 = vld [vmem:[#allocation5 + $0x10] sm:$0xff]  ;;  %v2239_v3 = vpack.c.bf16 %v47_v1, %v46_v0  ;;  %v49_v4 = vld [vmem:[#allocation5 + $0x18] sm:$0xff]  ;;  %v50_v6 = vld [vmem:[#allocation5 + $0x20] sm:$0xff] }
  0x28   :  { %v2241_v5 = vpack.c.bf16 %v49_v4, %v48_v2  ;;  %v51_v7 = vld [vmem:[#allocation5 + $0x28] sm:$0xff]  ;;  %v64_v9 = vld [vmem:[#allocation2] sm:$0xff]  ;;  %v52_v11 = vld [vmem:[#allocation5 + $0x30] sm:$0xff] }
  0x29   :  { %1695 = vmatprep.subr.bf16.mxu0 %v2239_v3  ;;  %1790 = vmatprep.subr.bf16.mxu1 %v2239_v3  ;;  %v2249_v8 = vpack.c.bf16 %v51_v7, %v50_v6  ;;  %v80_v10 = vld [vmem:[#allocation2 + $0x80] sm:$0xff]  ;;  %v53_v12 = vld [vmem:[#allocation5 + $0x38] sm:$0xff]  ;;  %v55_v15 = vld [vmem:[#allocation5 + $0x48] sm:$0xff] }
  0x2a   :  { %1697 = vmatpush3.bf16.msra.mxu0 %v2239_v3  ;;  %1798 = vmatpush3.bf16.msra.mxu1 %v2239_v3  ;;  %v2255_v13 = vpack.c.bf16 %v53_v12, %v52_v11  ;;  %v54_v14 = vld [vmem:[#allocation5 + $0x40] sm:$0xff]  ;;  %v56_v17 = vld [vmem:[#allocation5 + $0x50] sm:$0xff]  ;;  %v57_v18 = vld [vmem:[#allocation5 + $0x58] sm:$0xff] }
  0x2b   :  { %1699 = vmatprep.subr.bf16.mxu0 %v2241_v5  ;;  %1791 = vmatprep.subr.bf16.mxu1 %v2241_v5  ;;  %v2261_v16 = vpack.c.bf16 %v55_v15, %v54_v14  ;;  %v2267_v19 = vpack.c.bf16 %v57_v18, %v56_v17  ;;  %v58_v20 = vld [vmem:[#allocation5 + $0x60] sm:$0xff]  ;;  %v59_v21 = vld [vmem:[#allocation5 + $0x68] sm:$0xff]  ;;  %v60_v23 = vld [vmem:[#allocation5 + $0x70] sm:$0xff] }
  0x2c   :  { %1486 = vmatprep.mubr.f32.mxu0 %v64_v9  ;;  %1510 = vmatprep.mubr.f32.mxu1 %v80_v10  ;;  %v2273_v22 = vpack.c.bf16 %v59_v21, %v58_v20  ;;  %v61_v24 = vld [vmem:[#allocation5 + $0x78] sm:$0xff]  ;;  %v65_v26 = vld [vmem:[#allocation2 + $0x8] sm:$0xff]  ;;  %v66_v28 = vld [vmem:[#allocation2 + $0x10] sm:$0xff] }
  0x2d   :  { %v2279_v25 = vpack.c.bf16 %v61_v24, %v60_v23  ;;  %v81_v27 = vld [vmem:[#allocation2 + $0x88] sm:$0xff]  ;;  %v82_v29 = vld [vmem:[#allocation2 + $0x90] sm:$0xff]  ;;  %v67_v30 = vld [vmem:[#allocation2 + $0x18] sm:$0xff] }
  0x2e   :  { %1701 = vmatpush3.bf16.msra.mxu0 %v2241_v5  ;;  %1799 = vmatpush3.bf16.msra.mxu1 %v2241_v5  ;;  %v83_v31 = vld [vmem:[#allocation2 + $0x98] sm:$0xff]  ;;  %v68_v32 = vld [vmem:[#allocation2 + $0x20] sm:$0xff]  ;;  %v69_v34 = vld [vmem:[#allocation2 + $0x28] sm:$0xff] }
  0x2f   :  { %1703 = vmatprep.subr.bf16.mxu0 %v2249_v8  ;;  %1792 = vmatprep.subr.bf16.mxu1 %v2249_v8  ;;  %v84_v33 = vld [vmem:[#allocation2 + $0xa0] sm:$0xff]  ;;  %v85_v35 = vld [vmem:[#allocation2 + $0xa8] sm:$0xff]  ;;  %v70_v36 = vld [vmem:[#allocation2 + $0x30] sm:$0xff] }
  0x30   :  { %v86_v37 = vld [vmem:[#allocation2 + $0xb0] sm:$0xff]  ;;  %v71_v38 = vld [vmem:[#allocation2 + $0x38] sm:$0xff]  ;;  %v72_v40 = vld [vmem:[#allocation2 + $0x40] sm:$0xff] }
  0x31   :  { %v87_v39 = vld [vmem:[#allocation2 + $0xb8] sm:$0xff]  ;;  %v88_v41 = vld [vmem:[#allocation2 + $0xc0] sm:$0xff]  ;;  %v73_v42 = vld [vmem:[#allocation2 + $0x48] sm:$0xff] }
  0x32   :  { %1705 = vmatpush3.bf16.msra.mxu0 %v2249_v8  ;;  %1800 = vmatpush3.bf16.msra.mxu1 %v2249_v8  ;;  %v89_v43 = vld [vmem:[#allocation2 + $0xc8] sm:$0xff]  ;;  %v74_v44 = vld [vmem:[#allocation2 + $0x50] sm:$0xff]  ;;  %v75_v46 = vld [vmem:[#allocation2 + $0x58] sm:$0xff] }
  0x33   :  { %1707 = vmatprep.subr.bf16.mxu0 %v2255_v13  ;;  %1793 = vmatprep.subr.bf16.mxu1 %v2255_v13  ;;  %v90_v45 = vld [vmem:[#allocation2 + $0xd0] sm:$0xff]  ;;  %v91_v47 = vld [vmem:[#allocation2 + $0xd8] sm:$0xff]  ;;  %v76_v48 = vld [vmem:[#allocation2 + $0x60] sm:$0xff] }
  0x34   :  { %v92_v49 = vld [vmem:[#allocation2 + $0xe0] sm:$0xff]  ;;  %v77_v50 = vld [vmem:[#allocation2 + $0x68] sm:$0xff]  ;;  %v78_v52 = vld [vmem:[#allocation2 + $0x70] sm:$0xff] }
  0x35   :  { %v93_v51 = vld [vmem:[#allocation2 + $0xe8] sm:$0xff]  ;;  %v94_v53 = vld [vmem:[#allocation2 + $0xf0] sm:$0xff]  ;;  %v79_v54 = vld [vmem:[#allocation2 + $0x78] sm:$0xff] }
  0x36   :  { %1709 = vmatpush3.bf16.msra.mxu0 %v2255_v13  ;;  %1801 = vmatpush3.bf16.msra.mxu1 %v2255_v13  ;;  %v95_v55 = vld [vmem:[#allocation2 + $0xf8] sm:$0x3]  ;;  %v405_v56 = vld [vmem:[#allocation2 + $0x100] sm:$0xff]  ;;  %v406_v58 = vld [vmem:[#allocation2 + $0x108] sm:$0xff] }
  0x37   :  { %1711 = vmatprep.subr.bf16.mxu0 %v2261_v16  ;;  %1794 = vmatprep.subr.bf16.mxu1 %v2261_v16  ;;  %v738_v57 = vld [vmem:[#allocation2 + $0x200] sm:$0xff]  ;;  %v739_v59 = vld [vmem:[#allocation2 + $0x208] sm:$0xff]  ;;  %v407_v60 = vld [vmem:[#allocation2 + $0x110] sm:$0xff] }
  0x38   :  { %v740_v61 = vld [vmem:[#allocation2 + $0x210] sm:$0xff]  ;;  %v408_v62 = vld [vmem:[#allocation2 + $0x118] sm:$0xff]  ;;  %v409_v0 = vld [vmem:[#allocation2 + $0x120] sm:$0xff] }
  0x39   :  { %v741_v63 = vld [vmem:[#allocation2 + $0x218] sm:$0xff]  ;;  %v742_v1 = vld [vmem:[#allocation2 + $0x220] sm:$0xff]  ;;  %v410_v2 = vld [vmem:[#allocation2 + $0x128] sm:$0xff] }
  0x3a   :  { %1713 = vmatpush3.bf16.msra.mxu0 %v2261_v16  ;;  %1802 = vmatpush3.bf16.msra.mxu1 %v2261_v16  ;;  %v411_v4 = vld [vmem:[#allocation2 + $0x130] sm:$0xff]  ;;  %v412_v6 = vld [vmem:[#allocation2 + $0x138] sm:$0xff]  ;;  %v746_v9 = vld [vmem:[#allocation2 + $0x240] sm:$0xff] }
  0x3b   :  { %1715 = vmatprep.subr.bf16.mxu0 %v2267_v19  ;;  %1795 = vmatprep.subr.bf16.mxu1 %v2267_v19  ;;  %v745_v7 = vld [vmem:[#allocation2 + $0x238] sm:$0xff]  ;;  %v414_v10 = vld [vmem:[#allocation2 + $0x148] sm:$0xff]  ;;  %v415_v12 = vld [vmem:[#allocation2 + $0x150] sm:$0xff] }
  0x3c   :  { %v747_v11 = vld [vmem:[#allocation2 + $0x248] sm:$0xff]  ;;  %v416_v14 = vld [vmem:[#allocation2 + $0x158] sm:$0xff]  ;;  %v750_v17 = vld [vmem:[#allocation2 + $0x260] sm:$0xff] }
  0x3d   :  { %v749_v15 = vld [vmem:[#allocation2 + $0x258] sm:$0xff]  ;;  %v418_v18 = vld [vmem:[#allocation2 + $0x168] sm:$0xff]  ;;  %v419_v20 = vld [vmem:[#allocation2 + $0x170] sm:$0xff] }
  0x3e   :  { %1717 = vmatpush3.bf16.msra.mxu0 %v2267_v19  ;;  %1803 = vmatpush3.bf16.msra.mxu1 %v2267_v19  ;;  %v752_v21 = vld [vmem:[#allocation2 + $0x270] sm:$0xff]  ;;  %v753_v23 = vld [vmem:[#allocation2 + $0x278] sm:$0xff]  ;;  %v421_v24 = vld [vmem:[#allocation2 + $0x180] sm:$0xff] }
  0x3f   :  { %1719 = vmatprep.subr.bf16.mxu0 %v2273_v22  ;;  %1796 = vmatprep.subr.bf16.mxu1 %v2273_v22 }
  0x42   :  { %1721 = vmatpush3.bf16.msra.mxu0 %v2273_v22  ;;  %1804 = vmatpush3.bf16.msra.mxu1 %v2273_v22 }
  0x43   :  { %1723 = vmatprep.subr.bf16.mxu0 %v2279_v25  ;;  %1797 = vmatprep.subr.bf16.mxu1 %v2279_v25 }
  0x46   :  { %1725 = vmatpush3.bf16.msra.mxu0 %v2279_v25  ;;  %1805 = vmatpush3.bf16.msra.mxu1 %v2279_v25 }
  0x47   :  { %1727 = vmatprep.subr.bf16.mxu1 %v2239_v3  ;;  %1759 = vmatprep.subr.bf16.mxu0 %v2239_v3 }
  0x49   :  { %1487 = vmatmul.mubr.f32.vlgmr.msra.gmra.mrb[0].mxu0 %v65_v26  ;;  %1511 = vmatmul.mubr.f32.vlgmr.msra.gmra.mrb[0].mxu1 %v81_v27  ;;  %v422_v26 = vld [vmem:[#allocation2 + $0x188] sm:$0xff] }
  0x4a   :  { %1729 = vmatpush3.bf16.msra.mxu1 %v2239_v3  ;;  %1761 = vmatpush3.bf16.msra.mxu0 %v2239_v3  ;;  %v743_v3 = vld [vmem:[#allocation2 + $0x228] sm:$0xff] }
  0x4b   :  { %1489 = vmatprep.mubr.f32.mxu0 %v66_v28  ;;  %1513 = vmatprep.mubr.f32.mxu1 %v82_v29  ;;  %v755_v27 = vld [vmem:[#allocation2 + $0x288] sm:$0xff]  ;;  %v423_v28 = vld [vmem:[#allocation2 + $0x190] sm:$0xff] }
  0x4c   :  { %1731 = vmatprep.subr.bf16.mxu1 %v2241_v5  ;;  %1763 = vmatprep.subr.bf16.mxu0 %v2241_v5  ;;  %v756_v29 = vld [vmem:[#allocation2 + $0x290] sm:$0xff] }
  0x4d   :  { %1490 = vmatmul.mubr.f32.gmra.mrb[2].mxu0 %v67_v30  ;;  %1514 = vmatmul.mubr.f32.gmra.mrb[2].mxu1 %v83_v31  ;;  %v424_v30 = vld [vmem:[#allocation2 + $0x198] sm:$0xff] }
  0x4e   :  { %1733 = vmatpush3.bf16.msra.mxu1 %v2241_v5  ;;  %1765 = vmatpush3.bf16.msra.mxu0 %v2241_v5  ;;  %v744_v5 = vld [vmem:[#allocation2 + $0x230] sm:$0xff]  ;;  %v757_v31 = vld [vmem:[#allocation2 + $0x298] sm:$0xff] }
  0x4f   :  { %1492 = vmatprep.mubr.f32.mxu0 %v68_v32  ;;  %1516 = vmatprep.mubr.f32.mxu1 %v84_v33  ;;  %v425_v32 = vld [vmem:[#allocation2 + $0x1a0] sm:$0xff] }
  0x50   :  { %1735 = vmatprep.subr.bf16.mxu1 %v2249_v8  ;;  %1767 = vmatprep.subr.bf16.mxu0 %v2249_v8  ;;  %v758_v33 = vld [vmem:[#allocation2 + $0x2a0] sm:$0xff] }
  0x51   :  { %1493 = vmatmul.mubr.f32.gmra.mrb[4].mxu0 %v69_v34  ;;  %1517 = vmatmul.mubr.f32.gmra.mrb[4].mxu1 %v85_v35  ;;  %v426_v34 = vld [vmem:[#allocation2 + $0x1a8] sm:$0xff] }
  0x52   :  { %1737 = vmatpush3.bf16.msra.mxu1 %v2249_v8  ;;  %1769 = vmatpush3.bf16.msra.mxu0 %v2249_v8  ;;  %v413_v8 = vld [vmem:[#allocation2 + $0x140] sm:$0xff]  ;;  %v759_v35 = vld [vmem:[#allocation2 + $0x2a8] sm:$0xff] }
  0x53   :  { %1495 = vmatprep.mubr.f32.mxu0 %v70_v36  ;;  %1519 = vmatprep.mubr.f32.mxu1 %v86_v37  ;;  %v427_v36 = vld [vmem:[#allocation2 + $0x1b0] sm:$0xff] }
  0x54   :  { %1739 = vmatprep.subr.bf16.mxu1 %v2255_v13  ;;  %1771 = vmatprep.subr.bf16.mxu0 %v2255_v13  ;;  %v760_v37 = vld [vmem:[#allocation2 + $0x2b0] sm:$0xff] }
  0x55   :  { %1496 = vmatmul.mubr.f32.gmra.mrb[6].mxu0 %v71_v38  ;;  %1520 = vmatmul.mubr.f32.gmra.mrb[6].mxu1 %v87_v39  ;;  %v428_v38 = vld [vmem:[#allocation2 + $0x1b8] sm:$0xff] }
  0x56   :  { %1741 = vmatpush3.bf16.msra.mxu1 %v2255_v13  ;;  %1773 = vmatpush3.bf16.msra.mxu0 %v2255_v13  ;;  %v748_v13 = vld [vmem:[#allocation2 + $0x250] sm:$0xff]  ;;  %v761_v39 = vld [vmem:[#allocation2 + $0x2b8] sm:$0xff] }
  0x57   :  { %1498 = vmatprep.mubr.f32.mxu0 %v72_v40  ;;  %1522 = vmatprep.mubr.f32.mxu1 %v88_v41  ;;  %v429_v40 = vld [vmem:[#allocation2 + $0x1c0] sm:$0xff] }
  0x58   :  { %1743 = vmatprep.subr.bf16.mxu1 %v2261_v16  ;;  %1775 = vmatprep.subr.bf16.mxu0 %v2261_v16  ;;  %v762_v41 = vld [vmem:[#allocation2 + $0x2c0] sm:$0xff] }
  0x59   :  { %1499 = vmatmul.mubr.f32.gmra.mrb[8].mxu0 %v73_v42  ;;  %1523 = vmatmul.mubr.f32.gmra.mrb[8].mxu1 %v89_v43  ;;  %v430_v42 = vld [vmem:[#allocation2 + $0x1c8] sm:$0xff] }
  0x5a   :  { %1745 = vmatpush3.bf16.msra.mxu1 %v2261_v16  ;;  %1777 = vmatpush3.bf16.msra.mxu0 %v2261_v16  ;;  %v417_v16 = vld [vmem:[#allocation2 + $0x160] sm:$0xff]  ;;  %v763_v43 = vld [vmem:[#allocation2 + $0x2c8] sm:$0xff] }
  0x5b   :  { %1501 = vmatprep.mubr.f32.mxu0 %v74_v44  ;;  %1525 = vmatprep.mubr.f32.mxu1 %v90_v45  ;;  %v431_v44 = vld [vmem:[#allocation2 + $0x1d0] sm:$0xff] }
  0x5c   :  { %1747 = vmatprep.subr.bf16.mxu1 %v2267_v19  ;;  %1779 = vmatprep.subr.bf16.mxu0 %v2267_v19  ;;  %v764_v45 = vld [vmem:[#allocation2 + $0x2d0] sm:$0xff] }
  0x5d   :  { %1502 = vmatmul.mubr.f32.gmra.mrb[10].mxu0 %v75_v46  ;;  %1526 = vmatmul.mubr.f32.gmra.mrb[10].mxu1 %v91_v47  ;;  %v432_v46 = vld [vmem:[#allocation2 + $0x1d8] sm:$0xff] }
  0x5e   :  { %1749 = vmatpush3.bf16.msra.mxu1 %v2267_v19  ;;  %1781 = vmatpush3.bf16.msra.mxu0 %v2267_v19  ;;  %v751_v19 = vld [vmem:[#allocation2 + $0x268] sm:$0xff]  ;;  %v765_v47 = vld [vmem:[#allocation2 + $0x2d8] sm:$0xff] }
  0x5f   :  { %1504 = vmatprep.mubr.f32.mxu0 %v76_v48  ;;  %1528 = vmatprep.mubr.f32.mxu1 %v92_v49  ;;  %v433_v48 = vld [vmem:[#allocation2 + $0x1e0] sm:$0xff] }
  0x60   :  { %1751 = vmatprep.subr.bf16.mxu1 %v2273_v22  ;;  %1783 = vmatprep.subr.bf16.mxu0 %v2273_v22  ;;  %v766_v49 = vld [vmem:[#allocation2 + $0x2e0] sm:$0xff] }
  0x61   :  { %1505 = vmatmul.mubr.f32.gmra.mrb[12].mxu0 %v77_v50  ;;  %1529 = vmatmul.mubr.f32.gmra.mrb[12].mxu1 %v93_v51  ;;  %v434_v50 = vld [vmem:[#allocation2 + $0x1e8] sm:$0xff] }
  0x62   :  { %1753 = vmatpush3.bf16.msra.mxu1 %v2273_v22  ;;  %1785 = vmatpush3.bf16.msra.mxu0 %v2273_v22  ;;  %v420_v22 = vld [vmem:[#allocation2 + $0x178] sm:$0xff]  ;;  %v767_v51 = vld [vmem:[#allocation2 + $0x2e8] sm:$0xff] }
  0x63   :  { %1507 = vmatprep.mubr.f32.mxu0 %v78_v52  ;;  %1531 = vmatprep.mubr.f32.mxu1 %v94_v53  ;;  %v435_v52 = vld [vmem:[#allocation2 + $0x1f0] sm:$0xff] }
  0x64   :  { %1755 = vmatprep.subr.bf16.mxu1 %v2279_v25  ;;  %1787 = vmatprep.subr.bf16.mxu0 %v2279_v25  ;;  %v768_v53 = vld [vmem:[#allocation2 + $0x2f0] sm:$0xff] }
  0x65   :  { %1508 = vmatmul.mubr.f32.gmra.mrb[14].mxu0 %v79_v54  ;;  %1532 = vmatmul.mubr.f32.gmra.mrb[14].mxu1 %v95_v55  ;;  %v436_v54 = vld [vmem:[#allocation2 + $0x1f8] sm:$0x3] }
  0x66   :  { %1757 = vmatpush3.bf16.msra.mxu1 %v2279_v25  ;;  %1789 = vmatpush3.bf16.msra.mxu0 %v2279_v25  ;;  %v754_v25 = vld [vmem:[#allocation2 + $0x280] sm:$0xff]  ;;  %v769_v55 = vld [vmem:[#allocation2 + $0x2f8] sm:$0x3] }
  0x67   :  { %1566 = vmatprep.mubr.f32.mxu1 %v405_v56  ;;  %1646 = vmatprep.mubr.f32.mxu0 %v738_v57  ;;  %v2322_v56 = vld [vmem:[%s2884_s2] ss:$0 sm:$0xff] }
  0x69   :  { %1567 = vmatmul.mubr.f32.vlgmr.msra.gmra.mrb[16].mxu1 %v406_v58  ;;  %1647 = vmatmul.mubr.f32.vlgmr.msra.gmra.mrb[16].mxu0 %v739_v59 }
  0x6a   :  { %1569 = vmatprep.mubr.f32.mxu1 %v407_v60  ;;  %1649 = vmatprep.mubr.f32.mxu0 %v740_v61 }
  0x6d   :  { %1570 = vmatmul.mubr.f32.gmra.mrb[18].mxu1 %v408_v62  ;;  %1650 = vmatmul.mubr.f32.gmra.mrb[18].mxu0 %v741_v63 }
  0x6e   :  { %1572 = vmatprep.mubr.f32.mxu1 %v409_v0  ;;  %1652 = vmatprep.mubr.f32.mxu0 %v742_v1 }
  0x71   :  { %1573 = vmatmul.mubr.f32.gmra.mrb[20].mxu1 %v410_v2  ;;  %1653 = vmatmul.mubr.f32.gmra.mrb[20].mxu0 %v743_v3 }
  0x72   :  { %1575 = vmatprep.mubr.f32.mxu1 %v411_v4  ;;  %1655 = vmatprep.mubr.f32.mxu0 %v744_v5 }
  0x75   :  { %1576 = vmatmul.mubr.f32.gmra.mrb[22].mxu1 %v412_v6  ;;  %1656 = vmatmul.mubr.f32.gmra.mrb[22].mxu0 %v745_v7 }
  0x76   :  { %1578 = vmatprep.mubr.f32.mxu1 %v413_v8  ;;  %1658 = vmatprep.mubr.f32.mxu0 %v746_v9 }
  0x79   :  { %1579 = vmatmul.mubr.f32.gmra.mrb[24].mxu1 %v414_v10  ;;  %1659 = vmatmul.mubr.f32.gmra.mrb[24].mxu0 %v747_v11 }
  0x7a   :  { %1581 = vmatprep.mubr.f32.mxu1 %v415_v12  ;;  %1661 = vmatprep.mubr.f32.mxu0 %v748_v13 }
  0x7d   :  { %1582 = vmatmul.mubr.f32.gmra.mrb[26].mxu1 %v416_v14  ;;  %1662 = vmatmul.mubr.f32.gmra.mrb[26].mxu0 %v749_v15 }
  0x7e   :  { %1584 = vmatprep.mubr.f32.mxu1 %v417_v16  ;;  %1664 = vmatprep.mubr.f32.mxu0 %v750_v17 }
  0x81   :  { %1585 = vmatmul.mubr.f32.gmra.mrb[28].mxu1 %v418_v18  ;;  %1665 = vmatmul.mubr.f32.gmra.mrb[28].mxu0 %v751_v19 }
  0x82   :  { %1587 = vmatprep.mubr.f32.mxu1 %v419_v20  ;;  %1667 = vmatprep.mubr.f32.mxu0 %v752_v21 }
  0x85   :  { %1588 = vmatmul.mubr.f32.gmra.mrb[30].mxu1 %v420_v22  ;;  %1668 = vmatmul.mubr.f32.gmra.mrb[30].mxu0 %v753_v23 }
  0x86   :  { %1590 = vmatprep.mubr.f32.mxu1 %v421_v24  ;;  %1670 = vmatprep.mubr.f32.mxu0 %v754_v25 }
  0x89   :  { %1591 = vmatmul.mubr.f32.gmra.mrb[32].mxu1 %v422_v26  ;;  %1671 = vmatmul.mubr.f32.gmra.mrb[32].mxu0 %v755_v27 }
  0x8a   :  { %1593 = vmatprep.mubr.f32.mxu1 %v423_v28  ;;  %1673 = vmatprep.mubr.f32.mxu0 %v756_v29 }
  0x8d   :  { %1594 = vmatmul.mubr.f32.gmra.mrb[34].mxu1 %v424_v30  ;;  %1674 = vmatmul.mubr.f32.gmra.mrb[34].mxu0 %v757_v31 }
  0x8e   :  { %1596 = vmatprep.mubr.f32.mxu1 %v425_v32  ;;  %1676 = vmatprep.mubr.f32.mxu0 %v758_v33 }
  0x91   :  { %1597 = vmatmul.mubr.f32.gmra.mrb[36].mxu1 %v426_v34  ;;  %1677 = vmatmul.mubr.f32.gmra.mrb[36].mxu0 %v759_v35 }
  0x92   :  { %1599 = vmatprep.mubr.f32.mxu1 %v427_v36  ;;  %1679 = vmatprep.mubr.f32.mxu0 %v760_v37 }
  0x95   :  { %1600 = vmatmul.mubr.f32.gmra.mrb[38].mxu1 %v428_v38  ;;  %1680 = vmatmul.mubr.f32.gmra.mrb[38].mxu0 %v761_v39 }
  0x96   :  { %1602 = vmatprep.mubr.f32.mxu1 %v429_v40  ;;  %1682 = vmatprep.mubr.f32.mxu0 %v762_v41 }
  0x99   :  { %1603 = vmatmul.mubr.f32.gmra.mrb[40].mxu1 %v430_v42  ;;  %1683 = vmatmul.mubr.f32.gmra.mrb[40].mxu0 %v763_v43 }
  0x9a   :  { %1605 = vmatprep.mubr.f32.mxu1 %v431_v44  ;;  %1685 = vmatprep.mubr.f32.mxu0 %v764_v45 }
  0x9d   :  { %1606 = vmatmul.mubr.f32.gmra.mrb[42].mxu1 %v432_v46  ;;  %1686 = vmatmul.mubr.f32.gmra.mrb[42].mxu0 %v765_v47 }
  0x9e   :  { %1608 = vmatprep.mubr.f32.mxu1 %v433_v48  ;;  %1688 = vmatprep.mubr.f32.mxu0 %v766_v49 }
  0xa1   :  { %1609 = vmatmul.mubr.f32.gmra.mrb[44].mxu1 %v434_v50  ;;  %1689 = vmatmul.mubr.f32.gmra.mrb[44].mxu0 %v767_v51 }
  0xa2   :  { %1611 = vmatprep.mubr.f32.mxu1 %v435_v52  ;;  %1691 = vmatprep.mubr.f32.mxu0 %v768_v53 }
  0xa5   :  { %1612 = vmatmul.mubr.f32.gmra.mrb[46].mxu1 %v436_v54  ;;  %1692 = vmatmul.mubr.f32.gmra.mrb[46].mxu0 %v769_v55 }
 0x11c   :  { %v1512_v57 = vpop.f32.mrb[0].mxu1  ;;  %v1488_v58 = vpop.f32.mrb[0].mxu0 }
 0x11d   :  { %v254_v59 = vadd.f32 %v1512_v57, %v2322_v56  ;;  %v248_v60 = vpop.f32.mrb[1].mxu1  ;;  %v174_v61 = vadd.f32 %v1488_v58, %v2322_v56  ;;  %v168_v62 = vpop.f32.mrb[1].mxu0 }
 0x11e   :  { %v249_v63 = vadd.f32 %v2322_v56, %v248_v60  ;;  %v169_v0 = vadd.f32 %v2322_v56, %v168_v62 }
 0x11f   :  { %1811 = vtanh.f32 %v254_v59 }
 0x120   :  { %1813 = vtanh.f32 %v249_v63  ;;  %v1491_v1 = vpop.f32.mrb[2].mxu0  ;;  %v1515_v2 = vpop.f32.mrb[2].mxu1 }
 0x121   :  { %1815 = vtanh.f32 %v174_v61  ;;  %v184_v3 = vadd.f32 %v1491_v1, %v2322_v56  ;;  %v264_v4 = vadd.f32 %v1515_v2, %v2322_v56  ;;  %v178_v5 = vpop.f32.mrb[3].mxu0  ;;  %v258_v6 = vpop.f32.mrb[3].mxu1 }
 0x122   :  { %1817 = vtanh.f32 %v169_v0  ;;  %v179_v7 = vadd.f32 %v2322_v56, %v178_v5  ;;  %v259_v8 = vadd.f32 %v2322_v56, %v258_v6 }
 0x123   :  { %1819 = vtanh.f32 %v184_v3 }
 0x124   :  { %1821 = vtanh.f32 %v264_v4  ;;  %v1494_v9 = vpop.f32.mrb[4].mxu0  ;;  %v1518_v10 = vpop.f32.mrb[4].mxu1 }
 0x125   :  { %1823 = vtanh.f32 %v179_v7  ;;  %v194_v11 = vadd.f32 %v1494_v9, %v2322_v56  ;;  %v274_v12 = vadd.f32 %v1518_v10, %v2322_v56  ;;  %v188_v13 = vpop.f32.mrb[5].mxu0  ;;  %v268_v14 = vpop.f32.mrb[5].mxu1 }
 0x126   :  { %1825 = vtanh.f32 %v259_v8  ;;  %v189_v15 = vadd.f32 %v2322_v56, %v188_v13  ;;  %v269_v16 = vadd.f32 %v2322_v56, %v268_v14 }
 0x127   :  { %1827 = vtanh.f32 %v194_v11 }
 0x128   :  { %1829 = vtanh.f32 %v274_v12  ;;  %v1497_v17 = vpop.f32.mrb[6].mxu0  ;;  %v1521_v18 = vpop.f32.mrb[6].mxu1 }
 0x129   :  { %v2336_v19 = vpop.eup %1811  ;;  %1831 = vtanh.f32 %v189_v15  ;;  %v204_v20 = vadd.f32 %v1497_v17, %v2322_v56  ;;  %v284_v21 = vadd.f32 %v1521_v18, %v2322_v56  ;;  %v198_v22 = vpop.f32.mrb[7].mxu0 }
 0x12a   :  { %v278_v23 = vpop.f32.mrb[7].mxu1  ;;  %v2340_v24 = vpop.eup %1813  ;;  %1833 = vtanh.f32 %v269_v16  ;;  %v199_v25 = vadd.f32 %v2322_v56, %v198_v22 }
 0x12b   :  { %v279_v26 = vadd.f32 %v2322_v56, %v278_v23  ;;  %v1816_v27 = vpop.eup %1815  ;;  %1835 = vtanh.f32 %v204_v20 }
 0x12c   :  { %v1818_v28 = vpop.eup %1817  ;;  %1837 = vtanh.f32 %v284_v21  ;;  %v1500_v29 = vpop.f32.mrb[8].mxu0 }
 0x12d   :  { %v1524_v30 = vpop.f32.mrb[8].mxu1  ;;  %v1820_v31 = vpop.eup %1819  ;;  %v359_v32 = vadd.f32 %v1818_v28, %v1816_v27  ;;  %1839 = vtanh.f32 %v199_v25  ;;  %v214_v33 = vadd.f32 %v1500_v29, %v2322_v56 }
 0x12e   :  { %v294_v34 = vadd.f32 %v1524_v30, %v2322_v56  ;;  %v208_v35 = vpop.f32.mrb[9].mxu0  ;;  %v288_v36 = vpop.f32.mrb[9].mxu1  ;;  %1841 = vtanh.f32 %v279_v26 }
 0x12f   :  { %v2346_v37 = vpop.eup %1821  ;;  %v209_v38 = vadd.f32 %v2322_v56, %v208_v35  ;;  %v289_v39 = vadd.f32 %v2322_v56, %v288_v36  ;;  %1843 = vtanh.f32 %v214_v33 }
 0x130   :  { %v1824_v40 = vpop.eup %1823  ;;  %1845 = vtanh.f32 %v294_v34  ;;  %v1503_v43 = vpop.f32.mrb[10].mxu0 }
 0x131   :  { %v2350_v41 = vpop.eup %1825  ;;  %v360_v42 = vadd.f32 %v1824_v40, %v359_v32  ;;  %v1527_v44 = vpop.f32.mrb[10].mxu1  ;;  %1847 = vtanh.f32 %v209_v38  ;;  %v224_v46 = vadd.f32 %v1503_v43, %v2322_v56 }
 0x132   :  { %v1828_v45 = vpop.eup %1827  ;;  %v304_v47 = vadd.f32 %v1527_v44, %v2322_v56  ;;  %v218_v48 = vpop.f32.mrb[11].mxu0  ;;  %1849 = vtanh.f32 %v289_v39 }
 0x133   :  { %v298_v49 = vpop.f32.mrb[11].mxu1  ;;  %v2354_v50 = vpop.eup %1829  ;;  %v361_v51 = vadd.f32 %v1820_v31, %v360_v42  ;;  %v219_v52 = vadd.f32 %v2322_v56, %v218_v48  ;;  %1851 = vtanh.f32 %v224_v46 }
 0x134   :  { %v299_v53 = vadd.f32 %v2322_v56, %v298_v49  ;;  %v1832_v54 = vpop.eup %1831  ;;  %1853 = vtanh.f32 %v304_v47  ;;  %v1506_v58 = vpop.f32.mrb[12].mxu0 }
 0x135   :  { %v2358_v55 = vpop.eup %1833  ;;  %v362_v57 = vadd.f32 %v1832_v54, %v361_v51  ;;  %v1530_v59 = vpop.f32.mrb[12].mxu1  ;;  %1855 = vtanh.f32 %v219_v52  ;;  %v234_v61 = vadd.f32 %v1506_v58, %v2322_v56 }
 0x136   :  { %v1836_v60 = vpop.eup %1835  ;;  %v314_v62 = vadd.f32 %v1530_v59, %v2322_v56  ;;  %v228_v63 = vpop.f32.mrb[13].mxu0  ;;  %1857 = vtanh.f32 %v299_v53 }
 0x137   :  { %v308_v0 = vpop.f32.mrb[13].mxu1  ;;  %v2362_v1 = vpop.eup %1837  ;;  %v363_v2 = vadd.f32 %v1828_v45, %v362_v57  ;;  %v229_v3 = vadd.f32 %v2322_v56, %v228_v63  ;;  %1859 = vtanh.f32 %v234_v61 }
 0x138   :  { %v309_v4 = vadd.f32 %v2322_v56, %v308_v0  ;;  %v1840_v5 = vpop.eup %1839  ;;  %1861 = vtanh.f32 %v314_v62  ;;  %v1509_v8 = vpop.f32.mrb[14].mxu0 }
 0x139   :  { %v2366_v6 = vpop.eup %1841  ;;  %v364_v7 = vadd.f32 %v1840_v5, %v363_v2  ;;  %v1533_v9 = vpop.f32.mrb[14].mxu1  ;;  %1863 = vtanh.f32 %v229_v3  ;;  %v244_v11 = vadd.f32 %v1509_v8, %v2322_v56 }
 0x13a   :  { %v1844_v10 = vpop.eup %1843  ;;  %v324_v12 = vadd.f32 %v1533_v9, %v2322_v56  ;;  %v238_v13 = vpop.f32.mrb[15].mxu0  ;;  %1865 = vtanh.f32 %v309_v4 }
 0x13b   :  { %v318_v14 = vpop.f32.mrb[15].mxu1  ;;  %v2370_v15 = vpop.eup %1845  ;;  %v365_v16 = vadd.f32 %v1836_v60, %v364_v7  ;;  %v239_v17 = vadd.f32 %v2322_v56, %v238_v13  ;;  %1867 = vtanh.f32 %v244_v11 }
 0x13c   :  { %v319_v18 = vadd.f32 %v2322_v56, %v318_v14  ;;  %v1848_v20 = vpop.eup %1847  ;;  %1869 = vtanh.f32 %v324_v12  ;;  %v1568_v23 = vpop.f32.mrb[16].mxu1 }
 0x13d   :  { %v2374_v21 = vpop.eup %1849  ;;  %v366_v22 = vadd.f32 %v1848_v20, %v365_v16  ;;  %v1648_v25 = vpop.f32.mrb[16].mxu0  ;;  %1871 = vtanh.f32 %v239_v17  ;;  %v509_v27 = vadd.f32 %v1568_v23, %v2322_v56 }
 0x13e   :  { %v1852_v26 = vpop.eup %1851  ;;  %v503_v28 = vpop.f32.mrb[17].mxu1  ;;  %v842_v29 = vadd.f32 %v1648_v25, %v2322_v56  ;;  %1873 = vtanh.f32 %v319_v18 }
 0x13f   :  { %v836_v30 = vpop.f32.mrb[17].mxu0  ;;  %v2378_v31 = vpop.eup %1853  ;;  %v367_v32 = vadd.f32 %v1844_v10, %v366_v22  ;;  %v504_v33 = vadd.f32 %v2322_v56, %v503_v28  ;;  %1875 = vtanh.f32 %v509_v27 }
 0x140   :  { %v837_v34 = vadd.f32 %v2322_v56, %v836_v30  ;;  %v1856_v35 = vpop.eup %1855  ;;  %v1571_v39 = vpop.f32.mrb[18].mxu1 }
 0x141   :  { %v2382_v36 = vpop.eup %1857  ;;  %v368_v38 = vadd.f32 %v1856_v35, %v367_v32  ;;  %1877 = vtanh.f32 %v504_v33  ;;  %v1651_v40 = vpop.f32.mrb[18].mxu0  ;;  %v519_v43 = vadd.f32 %v1571_v39, %v2322_v56 }
 0x142   :  { %v1860_v42 = vpop.eup %1859  ;;  %1879 = vtanh.f32 %v842_v29  ;;  %v852_v44 = vadd.f32 %v1651_v40, %v2322_v56  ;;  %v513_v45 = vpop.f32.mrb[19].mxu1 }
 0x143   :  { %v846_v46 = vpop.f32.mrb[19].mxu0  ;;  %v2386_v47 = vpop.eup %1861  ;;  %v369_v48 = vadd.f32 %v1852_v26, %v368_v38  ;;  %1881 = vtanh.f32 %v837_v34  ;;  %v514_v49 = vadd.f32 %v2322_v56, %v513_v45 }
 0x144   :  { %v847_v51 = vadd.f32 %v2322_v56, %v846_v46  ;;  %v1864_v52 = vpop.eup %1863  ;;  %1883 = vtanh.f32 %v519_v43  ;;  %v1574_v57 = vpop.f32.mrb[20].mxu1 }
 0x145   :  { %v2390_v53 = vpop.eup %1865  ;;  %v370_v54 = vadd.f32 %v1864_v52, %v369_v48  ;;  %1885 = vtanh.f32 %v852_v44  ;;  %v1654_v58 = vpop.f32.mrb[20].mxu0  ;;  %v529_v60 = vadd.f32 %v1574_v57, %v2322_v56 }
 0x146   :  { %v1868_v59 = vpop.eup %1867  ;;  %1887 = vtanh.f32 %v514_v49  ;;  %v862_v61 = vadd.f32 %v1654_v58, %v2322_v56  ;;  %v523_v62 = vpop.f32.mrb[21].mxu1 }
 0x147   :  { %v856_v63 = vpop.f32.mrb[21].mxu0  ;;  %v2394_v0 = vpop.eup %1869  ;;  %v371_v2 = vadd.f32 %v1860_v42, %v370_v54  ;;  %1889 = vtanh.f32 %v847_v51  ;;  %v524_v3 = vadd.f32 %v2322_v56, %v523_v62 }
 0x148   :  { %v857_v4 = vadd.f32 %v2322_v56, %v856_v63  ;;  %v1872_v5 = vpop.eup %1871  ;;  %1891 = vtanh.f32 %v529_v60  ;;  %v1577_v9 = vpop.f32.mrb[22].mxu1 }
 0x149   :  { %v2398_v7 = vpop.eup %1873  ;;  %v372_v8 = vadd.f32 %v1872_v5, %v371_v2  ;;  %1893 = vtanh.f32 %v862_v61  ;;  %v1657_v10 = vpop.f32.mrb[22].mxu0  ;;  %v539_v12 = vadd.f32 %v1577_v9, %v2322_v56 }
 0x14a   :  { %v1876_v11 = vpop.eup %1875  ;;  %1895 = vtanh.f32 %v524_v3  ;;  %v872_v13 = vadd.f32 %v1657_v10, %v2322_v56  ;;  %v533_v14 = vpop.f32.mrb[23].mxu1 }
 0x14b   :  { %v866_v16 = vpop.f32.mrb[23].mxu0  ;;  %v1878_v17 = vpop.eup %1877  ;;  %v373_v18 = vadd.f32 %v1868_v59, %v372_v8  ;;  %1897 = vtanh.f32 %v857_v4  ;;  %v534_v20 = vadd.f32 %v2322_v56, %v533_v14 }
 0x14c   :  { %v867_v22 = vadd.f32 %v2322_v56, %v866_v16  ;;  %v1880_v23 = vpop.eup %1879  ;;  %v694_v25 = vadd.f32 %v1878_v17, %v1876_v11  ;;  %1899 = vtanh.f32 %v539_v12  ;;  %v1580_v28 = vpop.f32.mrb[24].mxu1 }
 0x14d   :  { %v1882_v26 = vpop.eup %1881  ;;  %v374_v27 = vadd.f32 %v2340_v24, %v373_v18  ;;  %1901 = vtanh.f32 %v872_v13  ;;  %v1660_v29 = vpop.f32.mrb[24].mxu0  ;;  %v549_v33 = vadd.f32 %v1580_v28, %v2322_v56 }
 0x14e   :  { %v1884_v30 = vpop.eup %1883  ;;  %v1027_v32 = vadd.f32 %v1882_v26, %v1880_v23  ;;  %1903 = vtanh.f32 %v534_v20  ;;  %v882_v34 = vadd.f32 %v1660_v29, %v2322_v56  ;;  %v543_v35 = vpop.f32.mrb[25].mxu1 }
 0x14f   :  { %v876_v38 = vpop.f32.mrb[25].mxu0  ;;  %v1886_v39 = vpop.eup %1885  ;;  %v375_v40 = vadd.f32 %v2336_v19, %v374_v27  ;;  %1905 = vtanh.f32 %v867_v22  ;;  %v544_v42 = vadd.f32 %v2322_v56, %v543_v35 }
 0x150   :  { %v877_v24 = vadd.f32 %v2322_v56, %v876_v38  ;;  %v1888_v43 = vpop.eup %1887  ;;  %1907 = vtanh.f32 %v549_v33  ;;  %v1583_v48 = vpop.f32.mrb[26].mxu1 }
 0x151   :  { %v1890_v44 = vpop.eup %1889  ;;  %v376_v45 = vadd.f32 %v2350_v41, %v375_v40  ;;  %v695_v46 = vadd.f32 %v1888_v43, %v694_v25  ;;  %1909 = vtanh.f32 %v882_v34  ;;  %v1663_v49 = vpop.f32.mrb[26].mxu0  ;;  %v559_v54 = vadd.f32 %v1583_v48, %v2322_v56 }
 0x152   :  { %v1892_v51 = vpop.eup %1891  ;;  %v1028_v52 = vadd.f32 %v1890_v44, %v1027_v32  ;;  %1911 = vtanh.f32 %v544_v42  ;;  %v892_v19 = vadd.f32 %v1663_v49, %v2322_v56  ;;  %v553_v57 = vpop.f32.mrb[27].mxu1 }
 0x153   :  { %v886_v58 = vpop.f32.mrb[27].mxu0  ;;  %v1894_v59 = vpop.eup %1893  ;;  %v377_v60 = vadd.f32 %v2346_v37, %v376_v45  ;;  %v696_v61 = vadd.f32 %v1884_v30, %v695_v46  ;;  %1913 = vtanh.f32 %v877_v24  ;;  %v554_v41 = vadd.f32 %v2322_v56, %v553_v57 }
 0x154   :  { %v1896_v62 = vpop.eup %1895  ;;  %v1029_v63 = vadd.f32 %v1886_v39, %v1028_v52  ;;  %1915 = vtanh.f32 %v559_v54  ;;  %v887_v2 = vadd.f32 %v2322_v56, %v886_v58  ;;  %v1586_v8 = vpop.f32.mrb[28].mxu1 }
 0x155   :  { %v1898_v3 = vpop.eup %1897  ;;  %v378_v4 = vadd.f32 %v2358_v55, %v377_v60  ;;  %v697_v5 = vadd.f32 %v1896_v62, %v696_v61  ;;  %1917 = vtanh.f32 %v892_v19  ;;  %v1666_v9 = vpop.f32.mrb[28].mxu0  ;;  %v569_v37 = vadd.f32 %v1586_v8, %v2322_v56 }
 0x156   :  { %v1900_v10 = vpop.eup %1899  ;;  %v1030_v11 = vadd.f32 %v1898_v3, %v1029_v63  ;;  %1919 = vtanh.f32 %v554_v41  ;;  %v902_v12 = vadd.f32 %v1666_v9, %v2322_v56  ;;  %v563_v13 = vpop.f32.mrb[29].mxu1 }
 0x157   :  { %v896_v14 = vpop.f32.mrb[29].mxu0  ;;  %v1902_v16 = vpop.eup %1901  ;;  %v379_v17 = vadd.f32 %v2354_v50, %v378_v4  ;;  %v698_v18 = vadd.f32 %v1892_v51, %v697_v5  ;;  %1921 = vtanh.f32 %v887_v2  ;;  %v564_v55 = vadd.f32 %v2322_v56, %v563_v13 }
 0x158   :  { %v1904_v20 = vpop.eup %1903  ;;  %v1031_v22 = vadd.f32 %v1894_v59, %v1030_v11  ;;  %1923 = vtanh.f32 %v569_v37  ;;  %v897_v23 = vadd.f32 %v2322_v56, %v896_v14  ;;  %v1589_v28 = vpop.f32.mrb[30].mxu1 }
 0x159   :  { %v1906_v25 = vpop.eup %1905  ;;  %v380_v26 = vadd.f32 %v2366_v6, %v379_v17  ;;  %v699_v27 = vadd.f32 %v1904_v20, %v698_v18  ;;  %1925 = vtanh.f32 %v902_v12  ;;  %v1669_v29 = vpop.f32.mrb[30].mxu0  ;;  %v579_v50 = vadd.f32 %v1589_v28, %v2322_v56 }
 0x15a   :  { %v1908_v30 = vpop.eup %1907  ;;  %v1032_v32 = vadd.f32 %v1906_v25, %v1031_v22  ;;  %1927 = vtanh.f32 %v564_v55  ;;  %v912_v33 = vadd.f32 %v1669_v29, %v2322_v56  ;;  %v573_v34 = vpop.f32.mrb[31].mxu1 }
 0x15b   :  { %v906_v35 = vpop.f32.mrb[31].mxu0  ;;  %v1910_v38 = vpop.eup %1909  ;;  %v381_v39 = vadd.f32 %v2362_v1, %v380_v26  ;;  %v700_v40 = vadd.f32 %v1900_v10, %v699_v27  ;;  %1929 = vtanh.f32 %v897_v23  ;;  %v574_v6 = vadd.f32 %v2322_v56, %v573_v34 }
 0x15c   :  { %v1912_v42 = vpop.eup %1911  ;;  %v1033_v24 = vadd.f32 %v1902_v16, %v1032_v32  ;;  %1931 = vtanh.f32 %v579_v50  ;;  %v907_v43 = vadd.f32 %v2322_v56, %v906_v35  ;;  %v1592_v48 = vpop.f32.mrb[32].mxu1 }
 0x15d   :  { %v1914_v44 = vpop.eup %1913  ;;  %v382_v45 = vadd.f32 %v2374_v21, %v381_v39  ;;  %v701_v46 = vadd.f32 %v1912_v42, %v700_v40  ;;  %1933 = vtanh.f32 %v912_v33  ;;  %v1672_v49 = vpop.f32.mrb[32].mxu0  ;;  %v589_v1 = vadd.f32 %v1592_v48, %v2322_v56 }
 0x15e   :  { %v1916_v51 = vpop.eup %1915  ;;  %v1034_v52 = vadd.f32 %v1914_v44, %v1033_v24  ;;  %1935 = vtanh.f32 %v574_v6  ;;  %v922_v54 = vadd.f32 %v1672_v49, %v2322_v56  ;;  %v583_v19 = vpop.f32.mrb[33].mxu1 }
 0x15f   :  { %v916_v57 = vpop.f32.mrb[33].mxu0  ;;  %v1918_v58 = vpop.eup %1917  ;;  %v383_v59 = vadd.f32 %v2370_v15, %v382_v45  ;;  %v702_v60 = vadd.f32 %v1908_v30, %v701_v46  ;;  %1937 = vtanh.f32 %v907_v43  ;;  %v584_v21 = vadd.f32 %v2322_v56, %v583_v19 }
 0x160   :  { %v1920_v61 = vpop.eup %1919  ;;  %v1035_v41 = vadd.f32 %v1910_v38, %v1034_v52  ;;  %1939 = vtanh.f32 %v589_v1  ;;  %v917_v62 = vadd.f32 %v2322_v56, %v916_v57  ;;  %v1595_v4 = vpop.f32.mrb[34].mxu1  ;;  %v390_v43 = vsel %vm389_vm0, %v2394_v0, 0.0 }
 0x161   :  { %v1922_v63 = vpop.eup %1921  ;;  %v384_v2 = vadd.f32 %v2382_v36, %v383_v59  ;;  %v703_v3 = vadd.f32 %v1920_v61, %v702_v60  ;;  %1941 = vtanh.f32 %v922_v54  ;;  %v1675_v5 = vpop.f32.mrb[34].mxu0  ;;  %v599_v15 = vadd.f32 %v1595_v4, %v2322_v56 }
 0x162   :  { %v1924_v8 = vpop.eup %1923  ;;  %v1036_v9 = vadd.f32 %v1922_v63, %v1035_v41  ;;  %1943 = vtanh.f32 %v584_v21  ;;  %v932_v10 = vadd.f32 %v1675_v5, %v2322_v56  ;;  %v593_v11 = vpop.f32.mrb[35].mxu1 }
 0x163   :  { %v926_v37 = vpop.f32.mrb[35].mxu0  ;;  %v1926_v12 = vpop.eup %1925  ;;  %v385_v13 = vadd.f32 %v2378_v31, %v384_v2  ;;  %v704_v14 = vadd.f32 %v1916_v51, %v703_v3  ;;  %1945 = vtanh.f32 %v917_v62  ;;  %v594_v36 = vadd.f32 %v2322_v56, %v593_v11 }
 0x164   :  { %v1928_v16 = vpop.eup %1927  ;;  %v1037_v17 = vadd.f32 %v1918_v58, %v1036_v9  ;;  %1947 = vtanh.f32 %v599_v15  ;;  %v927_v18 = vadd.f32 %v2322_v56, %v926_v37  ;;  %v1598_v23 = vpop.f32.mrb[36].mxu1 }
 0x165   :  { %v1930_v55 = vpop.eup %1929  ;;  %v386_v20 = vadd.f32 %v2390_v53, %v385_v13  ;;  %v705_v22 = vadd.f32 %v1928_v16, %v704_v14  ;;  %1949 = vtanh.f32 %v932_v10  ;;  %v1678_v25 = vpop.f32.mrb[36].mxu0  ;;  %v609_v31 = vadd.f32 %v1598_v23, %v2322_v56 }
 0x166   :  { %v1932_v26 = vpop.eup %1931  ;;  %v1038_v27 = vadd.f32 %v1930_v55, %v1037_v17  ;;  %1951 = vtanh.f32 %v594_v36  ;;  %v942_v28 = vadd.f32 %v1678_v25, %v2322_v56  ;;  %v603_v29 = vpop.f32.mrb[37].mxu1 }
 0x167   :  { %v936_v30 = vpop.f32.mrb[37].mxu0  ;;  %v1934_v32 = vpop.eup %1933  ;;  %v387_v50 = vadd.f32 %v2386_v47, %v386_v20  ;;  %v706_v33 = vadd.f32 %v1924_v8, %v705_v22  ;;  %1953 = vtanh.f32 %v927_v18  ;;  %v604_v53 = vadd.f32 %v2322_v56, %v603_v29 }
 0x168   :  { %v1936_v34 = vpop.eup %1935  ;;  %v1039_v35 = vadd.f32 %v1926_v12, %v1038_v27  ;;  %1955 = vtanh.f32 %v609_v31  ;;  %v937_v38 = vadd.f32 %v2322_v56, %v936_v30  ;;  %v1601_v42 = vpop.f32.mrb[38].mxu1 }
 0x169   :  { %v1938_v39 = vpop.eup %1937  ;;  %v388_v40 = vadd.f32 %v2398_v7, %v387_v50  ;;  %v707_v6 = vadd.f32 %v1936_v34, %v706_v33  ;;  %1957 = vtanh.f32 %v942_v28  ;;  %v1681_v24 = vpop.f32.mrb[38].mxu0  ;;  %v619_v45 = vadd.f32 %v1601_v42, %v2322_v56 }
 0x16a   :  { %v1940_v47 = vpop.eup %1939  ;;  %v1040_v44 = vadd.f32 %v1938_v39, %v1039_v35  ;;  %1959 = vtanh.f32 %v604_v53  ;;  %v952_v46 = vadd.f32 %v1681_v24, %v2322_v56  ;;  %v613_v48 = vpop.f32.mrb[39].mxu1 }
 0x16b   :  { %v946_v49 = vpop.f32.mrb[39].mxu0  ;;  %v1942_v51 = vpop.eup %1941  ;;  %v708_v52 = vadd.f32 %v1932_v26, %v707_v6  ;;  %1961 = vtanh.f32 %v937_v38  ;;  %v614_v7 = vadd.f32 %v2322_v56, %v613_v48  ;;  %v391_v0 = vadd.f32 %v390_v43, %v388_v40 }
 0x16c   :  { %v947_v1 = vadd.f32 %v2322_v56, %v946_v49  ;;  %v1944_v54 = vpop.eup %1943  ;;  %v1041_v19 = vadd.f32 %v1934_v32, %v1040_v44  ;;  %1963 = vtanh.f32 %v619_v45  ;;  %v1604_v59 = vpop.f32.mrb[40].mxu1 }
 0x16d   :  { %v1946_v57 = vpop.eup %1945  ;;  %v709_v58 = vadd.f32 %v1944_v54, %v708_v52  ;;  %1965 = vtanh.f32 %v952_v46  ;;  %v1684_v60 = vpop.f32.mrb[40].mxu0  ;;  %v629_v41 = vadd.f32 %v1604_v59, %v2322_v56  ;;  %v392_v10 = vrot.slane %v391_v0, 4 }
 0x16e   :  { %v1948_v21 = vpop.eup %1947  ;;  %v1042_v61 = vadd.f32 %v1946_v57, %v1041_v19  ;;  %1967 = vtanh.f32 %v614_v7  ;;  %v962_v62 = vadd.f32 %v1684_v60, %v2322_v56  ;;  %v623_v63 = vpop.f32.mrb[41].mxu1 }
 0x16f   :  { %v956_v2 = vpop.f32.mrb[41].mxu0  ;;  %v1950_v3 = vpop.eup %1949  ;;  %v710_v4 = vadd.f32 %v1940_v47, %v709_v58  ;;  %1969 = vtanh.f32 %v947_v1  ;;  %v624_v5 = vadd.f32 %v2322_v56, %v623_v63  ;;  %v393_v31 = vadd.f32 %v392_v10, %v391_v0 }
 0x170   :  { %v957_v8 = vadd.f32 %v2322_v56, %v956_v2  ;;  %v1952_v9 = vpop.eup %1951  ;;  %v1043_v15 = vadd.f32 %v1942_v51, %v1042_v61  ;;  %1971 = vtanh.f32 %v629_v41  ;;  %v1607_v12 = vpop.f32.mrb[42].mxu1 }
 0x171   :  { %v1954_v11 = vpop.eup %1953  ;;  %v711_v37 = vadd.f32 %v1952_v9, %v710_v4  ;;  %1973 = vtanh.f32 %v962_v62  ;;  %v1687_v13 = vpop.f32.mrb[42].mxu0  ;;  %v639_v16 = vadd.f32 %v1607_v12, %v2322_v56  ;;  %v394_v47 = vrot.slane %v393_v31, 2 }
 0x172   :  { %v1956_v14 = vpop.eup %1955  ;;  %v1044_v36 = vadd.f32 %v1954_v11, %v1043_v15  ;;  %1975 = vtanh.f32 %v624_v5  ;;  %v972_v17 = vadd.f32 %v1687_v13, %v2322_v56  ;;  %v633_v18 = vpop.f32.mrb[43].mxu1 }
 0x173   :  { %v966_v55 = vpop.f32.mrb[43].mxu0  ;;  %v1958_v20 = vpop.eup %1957  ;;  %v712_v22 = vadd.f32 %v1948_v21, %v711_v37  ;;  %1977 = vtanh.f32 %v957_v8  ;;  %v634_v23 = vadd.f32 %v2322_v56, %v633_v18  ;;  %v395_v21 = vadd.f32 %v394_v47, %v393_v31 }
 0x174   :  { %v967_v25 = vadd.f32 %v2322_v56, %v966_v55  ;;  %v1960_v26 = vpop.eup %1959  ;;  %v1045_v27 = vadd.f32 %v1950_v3, %v1044_v36  ;;  %1979 = vtanh.f32 %v639_v16  ;;  %v1610_v30 = vpop.f32.mrb[44].mxu1 }
 0x175   :  { %v1962_v28 = vpop.eup %1961  ;;  %v713_v29 = vadd.f32 %v1960_v26, %v712_v22  ;;  %1981 = vtanh.f32 %v972_v17  ;;  %v1690_v32 = vpop.f32.mrb[44].mxu0  ;;  %v649_v53 = vadd.f32 %v1610_v30, %v2322_v56  ;;  %v396_v2 = vrot.slane %v395_v21, 1 }
 0x176   :  { %v1964_v50 = vpop.eup %1963  ;;  %v1046_v33 = vadd.f32 %v1962_v28, %v1045_v27  ;;  %1983 = vtanh.f32 %v634_v23  ;;  %v982_v34 = vadd.f32 %v1690_v32, %v2322_v56  ;;  %v643_v35 = vpop.f32.mrb[45].mxu1 }
 0x177   :  { %v976_v38 = vpop.f32.mrb[45].mxu0  ;;  %v1966_v39 = vpop.eup %1965  ;;  %v714_v40 = vadd.f32 %v1956_v14, %v713_v29  ;;  %1985 = vtanh.f32 %v967_v25  ;;  %v644_v6 = vadd.f32 %v2322_v56, %v643_v35  ;;  %v397_v9 = vadd.f32 %v396_v2, %v395_v21 }
 0x178   :  { %v977_v42 = vadd.f32 %v2322_v56, %v976_v38  ;;  %v1968_v24 = vpop.eup %1967  ;;  %v1047_v43 = vadd.f32 %v1958_v20, %v1046_v33  ;;  %1987 = vtanh.f32 %v649_v53  ;;  %v1613_v46 = vpop.f32.mrb[46].mxu1 }
 0x179   :  { %v1970_v44 = vpop.eup %1969  ;;  %v715_v45 = vadd.f32 %v1968_v24, %v714_v40  ;;  %1989 = vtanh.f32 %v982_v34  ;;  %v1693_v48 = vpop.f32.mrb[46].mxu0  ;;  %v659_v52 = vadd.f32 %v1613_v46, %v2322_v56  ;;  %v398_v12 = vmul.f32 0.004, %v397_v9 }
 0x17a   :  { %v1972_v49 = vpop.eup %1971  ;;  %v1048_v51 = vadd.f32 %v1970_v44, %v1047_v43  ;;  %1991 = vtanh.f32 %v644_v6  ;;  %v992_v7 = vadd.f32 %v1693_v48, %v2322_v56  ;;  %v653_v1 = vpop.f32.mrb[47].mxu1 }
 0x17b   :  { %v986_v54 = vpop.f32.mrb[47].mxu0  ;;  %v1974_v19 = vpop.eup %1973  ;;  %v716_v0 = vadd.f32 %v1964_v50, %v715_v45  ;;  %1993 = vtanh.f32 %v977_v42  ;;  %v654_v57 = vadd.f32 %v2322_v56, %v653_v1 }
 0x17c   :  { %v987_v58 = vadd.f32 %v2322_v56, %v986_v54  ;;  %v1976_v59 = vpop.eup %1975  ;;  %v1049_v60 = vadd.f32 %v1966_v39, %v1048_v51  ;;  %1995 = vtanh.f32 %v659_v52  ;;  %v63_v56 = vld [vmem:[%s2885_s3] sm:$0x1]  ;;  %s2183_s3 = smov [#allocation7]  }
 0x17d   :  { %v1978_v61 = vpop.eup %1977  ;;  %v717_v41 = vadd.f32 %v1976_v59, %v716_v0  ;;  %1997 = vtanh.f32 %v992_v7  ;;  %v399_v17 = vmul.f32 %v398_v12, %v63_v56  ;;  %s1296_s16 = sshll.u32 %s2183_s3, 4  ;;  %s1297_s16 = int_to_ptr.vmem [resolvable:$true] %s1296_s16 }
 0x17e   :  { %v1980_v62 = vpop.eup %1979  ;;  %v1050_v63 = vadd.f32 %v1978_v61, %v1049_v60  ;;  %1999 = vtanh.f32 %v654_v57  ;;  %s2151_s17 = scalar_lea.vmem %s1297_s16, 4096  ;;  %p2156_p3 = scmp.lt.s32.totalorder %s1297_s16, %s1297_s16 }
 0x17f   :  { %v1982_v3 = vpop.eup %1981  ;;  %v718_v4 = vadd.f32 %v1972_v49, %v717_v41  ;;  %2001 = vtanh.f32 %v987_v58  ;;  %v401_v23 = vsel %vm400_vm1, %v399_v17, 0.0  ;;  %p2152_p2 = scmp.ne.s32.totalorder %s1297_s16, %s2151_s17  ;;  %p2157_p4 = scmp.lt.s32.totalorder %s2151_s17, %s2151_s17 }
 0x180   :  { %v1984_v5 = vpop.eup %1983  ;;  %v1051_v8 = vadd.f32 %v1974_v19, %v1050_v63  ;;  %402 = vadd.xlane.f32.xlu0 %v401_v23  ;;  %v2015_v23 = vld [vmem:[#allocation2 + $0x20] sm:$0xff] }
 0x181   :  { %v1986_v15 = vpop.eup %1985  ;;  %v719_v10 = vadd.f32 %v1984_v5, %v718_v4  ;;  %v1085_v5 = vlaneseq  ;;  %p2158_p5 = por %p2157_p4, %p2156_p3 }
 0x182   :  { %v1988_v11 = vpop.eup %1987  ;;  %v1052_v37 = vadd.f32 %v1986_v15, %v1051_v8 }
 0x183   :  { %v1990_v13 = vpop.eup %1989  ;;  %v720_v14 = vadd.f32 %v1980_v62, %v719_v10  ;;  %v1086_v8 = vshrl.u32 %v1085_v5, 7  ;;  %v2038_v5 = vld [vmem:[#allocation2 + $0xd8] sm:$0xff]  ;;  %p2159_p6 = pnand %p2158_p5, %p2152_p2 }
 0x184   :  { %v1992_v36 = vpop.eup %1991  ;;  %v1053_v16 = vadd.f32 %v1982_v3, %v1052_v37 }
 0x185   :  { %v1994_v18 = vpop.eup %1993  ;;  %v721_v55 = vadd.f32 %v1992_v36, %v720_v14  ;;  %v1087_v9 = vsub.s32 0, %v1086_v8  ;;  %v2011_v14 = vld [vmem:[#allocation2] sm:$0xff] }
 0x186   :  { %v1996_v20 = vpop.eup %1995  ;;  %v1054_v22 = vadd.f32 %v1994_v18, %v1053_v16  ;;  %v2012_v16 = vld [vmem:[#allocation2 + $0x8] sm:$0xff]  ;;  %v2013_v18 = vld [vmem:[#allocation2 + $0x10] sm:$0xff] }
 0x187   :  { %v1998_v25 = vpop.eup %1997  ;;  %v722_v26 = vadd.f32 %v1988_v11, %v721_v55  ;;  %v724_v50 = vsel %vm389_vm0, %v1996_v20, 0.0  ;;  %v2014_v20 = vld [vmem:[#allocation2 + $0x18] sm:$0xff] }
 0x188   :  { %v2000_v27 = vpop.eup %1999  ;;  %v1055_v31 = vadd.f32 %v1990_v13, %v1054_v22  ;;  %v1057_v30 = vsel %vm389_vm0, %v1998_v25, 0.0 }
 0x189   :  { %v2002_v28 = vpop.eup %2001  ;;  %v723_v29 = vadd.f32 %v2000_v27, %v722_v26  ;;  %v2016_v26 = vld [vmem:[#allocation2 + $0x28] sm:$0xff] }
 0x18a   :  { %v1056_v32 = vadd.f32 %v2002_v28, %v1055_v31  ;;  %v2017_v31 = vld [vmem:[#allocation2 + $0x30] sm:$0xff] }
 0x18b   :  { %v725_v33 = vadd.f32 %v724_v50, %v723_v29  ;;  %v2018_v29 = vld [vmem:[#allocation2 + $0x38] sm:$0xff] }
 0x18c   :  { %v1058_v53 = vadd.f32 %v1057_v30, %v1056_v32  ;;  %v2019_v32 = vld [vmem:[#allocation2 + $0x40] sm:$0xff] }
 0x18d   :  { %v726_v34 = vrot.slane %v725_v33, 4 }
 0x18e   :  { %v1059_v35 = vrot.slane %v1058_v53, 4 }
 0x18f   :  { %v727_v38 = vadd.f32 %v726_v34, %v725_v33  ;;  %v2020_v33 = vld [vmem:[#allocation2 + $0x48] sm:$0xff]  ;;  %v2021_v34 = vld [vmem:[#allocation2 + $0x50] sm:$0xff] }
 0x190   :  { %v1060_v39 = vadd.f32 %v1059_v35, %v1058_v53 }
 0x191   :  { %v728_v40 = vrot.slane %v727_v38, 2 }
 0x192   :  { %v1061_v6 = vrot.slane %v1060_v39, 2 }
 0x193   :  { %v729_v42 = vadd.f32 %v728_v40, %v727_v38  ;;  %v2022_v38 = vld [vmem:[#allocation2 + $0x58] sm:$0xff]  ;;  %v2023_v40 = vld [vmem:[#allocation2 + $0x60] sm:$0xff] }
 0x194   :  { %v1062_v24 = vadd.f32 %v1061_v6, %v1060_v39 }
 0x195   :  { %v730_v43 = vrot.slane %v729_v42, 1 }
 0x196   :  { %v1063_v47 = vrot.slane %v1062_v24, 1 }
 0x197   :  { %v731_v44 = vadd.f32 %v730_v43, %v729_v42  ;;  %v2024_v42 = vld [vmem:[#allocation2 + $0x68] sm:$0xff]  ;;  %v2025_v43 = vld [vmem:[#allocation2 + $0x70] sm:$0xff] }
 0x198   :  { %v1064_v45 = vadd.f32 %v1063_v47, %v1062_v24 }
 0x199   :  { %v732_v46 = vmul.f32 0.004, %v731_v44  ;;  %v2026_v44 = vld [vmem:[#allocation2 + $0x78] sm:$0xff] }
 0x19a   :  { %v1065_v48 = vmul.f32 0.004, %v1064_v45 }
 0x19b   :  { %v733_v49 = vmul.f32 %v732_v46, %v63_v56  ;;  %v2027_v46 = vld [vmem:[#allocation2 + $0x80] sm:$0xff] }
 0x19c   :  { %v1066_v51 = vmul.f32 %v1065_v48, %v63_v56 }
 0x19d   :  { %v734_v52 = vsel %vm400_vm1, %v733_v49, 0.0  ;;  %v2028_v49 = vld [vmem:[#allocation2 + $0x88] sm:$0xff] }
 0x19e   :  { %v1067_v7 = vsel %vm400_vm1, %v1066_v51, 0.0  ;;  %735 = vadd.xlane.f32.xlu0 %v734_v52  ;;  %v2029_v52 = vld [vmem:[#allocation2 + $0x90] sm:$0xff] }
 0x19f   :  { %1068 = vadd.xlane.f32.xlu1 %v1067_v7 }
 0x20d   :  { %v403_v1 = vpop.xlane.xlu0 %402 }
 0x22b   :  { %v736_v54 = vpop.xlane.xlu0 %735 }
 0x22c   :  { %v1070_v19 = vmax.f32 %v403_v1, %v736_v54  ;;  %v1069_v0 = vpop.xlane.xlu1 %1068 }
 0x22e   :  { %v1071_v57 = vmax.f32 %v1070_v19, %v1069_v0  ;;  %v2031_v19 = vld [vmem:[#allocation2 + $0xa0] sm:$0xff] }
 0x230   :  { %v1072_v58 = vsub.f32 %v403_v1, %v1071_v57  ;;  %v1075_v59 = vsub.f32 %v736_v54, %v1071_v57  ;;  %v1078_v60 = vsub.f32 %v1069_v0, %v1071_v57  ;;  %v2030_v1 = vld [vmem:[#allocation2 + $0x98] sm:$0xff]  ;;  %v2032_v57 = vld [vmem:[#allocation2 + $0xa8] sm:$0xff] }
 0x232   :  { %v1073_v21 = vmul.f32 1.442695, %v1072_v58  ;;  %v1076_v61 = vmul.f32 1.442695, %v1075_v59  ;;  %v1079_v41 = vmul.f32 1.442695, %v1078_v60 }
 0x233   :  { %v2033_v59 = vld [vmem:[#allocation2 + $0xb0] sm:$0xff] }
 0x234   :  { %2003 = vpow2.f32 %v1073_v21  ;;  %v2034_v21 = vld [vmem:[#allocation2 + $0xb8] sm:$0xff] }
 0x235   :  { %2005 = vpow2.f32 %v1076_v61 }
 0x236   :  { %2007 = vpow2.f32 %v1079_v41  ;;  %v2035_v41 = vld [vmem:[#allocation2 + $0xc0] sm:$0xff] }
 0x23e   :  { %v2004_v62 = vpop.eup %2003 }
 0x23f   :  { %v2006_v63 = vpop.eup %2005 }
 0x240   :  { %v1081_v2 = vadd.f32 %v2006_v63, %v2004_v62  ;;  %v2008_v3 = vpop.eup %2007 }
 0x242   :  { %v1082_v4 = vadd.f32 %v2008_v3, %v1081_v2 }
 0x244   :  { %2009 = vrcp.f32 %v1082_v4 }
 0x24e   :  { %v2010_v15 = vpop.eup %2009 }
 0x24f   :  { %v1084_v10 = vmul.f32 %v2010_v15, %v2004_v62  ;;  %v1121_v56 = vmul.f32 %v2010_v15, %v2006_v63  ;;  %v1190_v11 = vmul.f32 %v2010_v15, %v2008_v3  ;;  %v2036_v63 = vld [vmem:[#allocation2 + $0xc8] sm:$0xff]  ;;  %v2037_v3 = vld [vmem:[#allocation2 + $0xd0] sm:$0xff] }
 0x251   :  { %v2477_v37 = vrot.slane %v1084_v10, %v1087_v9  ;;  %v2479_v12 = vrot.slane %v1121_v56, %v1087_v9  ;;  %v2481_v13 = vrot.slane %v1190_v11, %v1087_v9  ;;  %v2039_v9 = vld [vmem:[#allocation2 + $0xe0] sm:$0xff]  ;;  %v2040_v10 = vld [vmem:[#allocation2 + $0xe8] sm:$0xff]  ;;  %v2041_v11 = vld [vmem:[#allocation2 + $0xf0] sm:$0xff] }
 0x253   :  { %v2484_v36 = vmul.f32 %v2011_v14, %v2477_v37  ;;  %v2487_v17 = vmul.f32 %v2012_v16, %v2477_v37  ;;  %v2490_v55 = vmul.f32 %v2013_v18, %v2477_v37  ;;  %v2493_v22 = vmul.f32 %v2014_v20, %v2477_v37  ;;  %v2042_v16 = vld [vmem:[#allocation2 + $0xf8] sm:$0x3]  ;;  %v2043_v20 = vld [vmem:[#allocation2 + $0x100] sm:$0xff] }
 0x254   :  { %v2496_v25 = vmul.f32 %v2015_v23, %v2477_v37  ;;  %v2499_v27 = vmul.f32 %v2016_v26, %v2477_v37  ;;  %v2502_v28 = vmul.f32 %v2017_v31, %v2477_v37  ;;  %v2505_v30 = vmul.f32 %v2018_v29, %v2477_v37  ;;  %v2044_v26 = vld [vmem:[#allocation2 + $0x108] sm:$0xff]  ;;  %v2045_v29 = vld [vmem:[#allocation2 + $0x110] sm:$0xff] }
 0x255   :  { %v2508_v50 = vmul.f32 %v2019_v32, %v2477_v37  ;;  %v2511_v53 = vmul.f32 %v2020_v33, %v2477_v37  ;;  %v2514_v35 = vmul.f32 %v2021_v34, %v2477_v37  ;;  %v2517_v39 = vmul.f32 %v2022_v38, %v2477_v37  ;;  %v2046_v33 = vld [vmem:[#allocation2 + $0x118] sm:$0xff]  ;;  %v2047_v38 = vld [vmem:[#allocation2 + $0x120] sm:$0xff] }
 0x256   :  { %v2520_v6 = vmul.f32 %v2023_v40, %v2477_v37  ;;  %v2523_v24 = vmul.f32 %v2024_v42, %v2477_v37  ;;  %v2526_v47 = vmul.f32 %v2025_v43, %v2477_v37  ;;  %v2529_v45 = vmul.f32 %v2026_v44, %v2477_v37  ;;  %v2048_v40 = vld [vmem:[#allocation2 + $0x128] sm:$0xff]  ;;  %v2049_v43 = vld [vmem:[#allocation2 + $0x130] sm:$0xff] }
 0x257   :  { %v2532_v48 = vmul.f32 %v2027_v46, %v2477_v37  ;;  %v2535_v51 = vmul.f32 %v2028_v49, %v2477_v37  ;;  %v2538_v7 = vmul.f32 %v2029_v52, %v2477_v37  ;;  %v2541_v54 = vmul.f32 %v2030_v1, %v2477_v37  ;;  %v2050_v46 = vld [vmem:[#allocation2 + $0x138] sm:$0xff]  ;;  %v2051_v52 = vld [vmem:[#allocation2 + $0x140] sm:$0xff] }
 0x258   :  { %v2544_v0 = vmul.f32 %v2031_v19, %v2477_v37  ;;  %v2547_v58 = vmul.f32 %v2032_v57, %v2477_v37  ;;  %v2550_v60 = vmul.f32 %v2033_v59, %v2477_v37  ;;  %v2553_v61 = vmul.f32 %v2034_v21, %v2477_v37  ;;  %v2052_v19 = vld [vmem:[#allocation2 + $0x148] sm:$0xff]  ;;  %v2053_v59 = vld [vmem:[#allocation2 + $0x150] sm:$0xff] }
 0x259   :  { %v2556_v62 = vmul.f32 %v2035_v41, %v2477_v37  ;;  %v2559_v2 = vmul.f32 %v2036_v63, %v2477_v37  ;;  %v2562_v4 = vmul.f32 %v2037_v3, %v2477_v37  ;;  %v2565_v8 = vmul.f32 %v2038_v5, %v2477_v37  ;;  %v2054_v41 = vld [vmem:[#allocation2 + $0x158] sm:$0xff]  ;;  %v2055_v3 = vld [vmem:[#allocation2 + $0x160] sm:$0xff] }
 0x25a   :  { %v2568_v15 = vmul.f32 %v2039_v9, %v2477_v37  ;;  %v2571_v56 = vmul.f32 %v2040_v10, %v2477_v37  ;;  %v2574_v14 = vmul.f32 %v2041_v11, %v2477_v37  ;;  %v2577_v18 = vmul.f32 %v2042_v16, %v2477_v37  ;;  %v2056_v9 = vld [vmem:[#allocation2 + $0x168] sm:$0xff]  ;;  %v2057_v11 = vld [vmem:[#allocation2 + $0x170] sm:$0xff] }
 0x25b   :  { %2887 = vst [vmem:[#allocation11_spill] sm:$0xff] %v2562_v4  ;;  %2888 = vst [vmem:[#allocation12_spill] sm:$0xff] %v2565_v8  ;;  %v2580_v23 = vmul.f32 %v2043_v20, %v2479_v12  ;;  %v2583_v31 = vmul.f32 %v2044_v26, %v2479_v12  ;;  %v2586_v32 = vmul.f32 %v2045_v29, %v2479_v12  ;;  %v2058_v20 = vld [vmem:[#allocation2 + $0x178] sm:$0xff]  ;;  %v2059_v29 = vld [vmem:[#allocation2 + $0x180] sm:$0xff] }
 0x25c   :  { %2889 = vst [vmem:[#allocation13_spill] sm:$0xff] %v2568_v15  ;;  %2890 = vst [vmem:[#allocation14_spill] sm:$0xff] %v2571_v56  ;;  %v2589_v34 = vmul.f32 %v2046_v33, %v2479_v12  ;;  %v2592_v37 = vmul.f32 %v2047_v38, %v2479_v12  ;;  %v2595_v42 = vmul.f32 %v2048_v40, %v2479_v12  ;;  %v2060_v38 = vld [vmem:[#allocation2 + $0x188] sm:$0xff]  ;;  %v2070_v56 = vld [vmem:[#allocation2 + $0x1d8] sm:$0xff] }
 0x25d   :  { %2891 = vst [vmem:[#allocation15_spill] sm:$0xff] %v2574_v14  ;;  %2892 = vst [vmem:[#allocation16_spill] sm:$0xff] %v2577_v18  ;;  %v2598_v44 = vmul.f32 %v2049_v43, %v2479_v12  ;;  %v2601_v49 = vmul.f32 %v2050_v46, %v2479_v12  ;;  %v2604_v1 = vmul.f32 %v2051_v52, %v2479_v12  ;;  %v2061_v43 = vld [vmem:[#allocation2 + $0x190] sm:$0xff]  ;;  %v2062_v52 = vld [vmem:[#allocation2 + $0x198] sm:$0xff] }
 0x25e   :  { %v2607_v57 = vmul.f32 %v2052_v19, %v2479_v12  ;;  %v2610_v21 = vmul.f32 %v2053_v59, %v2479_v12  ;;  %v2613_v63 = vmul.f32 %v2054_v41, %v2479_v12  ;;  %v2616_v5 = vmul.f32 %v2055_v3, %v2479_v12  ;;  %v2063_v59 = vld [vmem:[#allocation2 + $0x1a0] sm:$0xff]  ;;  %v2064_v3 = vld [vmem:[#allocation2 + $0x1a8] sm:$0xff]  ;;  %v2069_v14 = vld [vmem:[#allocation2 + $0x1d0] sm:$0xff] }
 0x25f   :  { %v2619_v10 = vmul.f32 %v2056_v9, %v2479_v12  ;;  %v2622_v16 = vmul.f32 %v2057_v11, %v2479_v12  ;;  %v2625_v26 = vmul.f32 %v2058_v20, %v2479_v12  ;;  %v2628_v33 = vmul.f32 %v2059_v29, %v2479_v12  ;;  %v2065_v11 = vld [vmem:[#allocation2 + $0x1b0] sm:$0xff]  ;;  %v2066_v29 = vld [vmem:[#allocation2 + $0x1b8] sm:$0xff]  ;;  %v2068_v18 = vld [vmem:[#allocation2 + $0x1c8] sm:$0xff] }
 0x260   :  { %v2631_v40 = vmul.f32 %v2060_v38, %v2479_v12  ;;  %v2634_v46 = vmul.f32 %v2061_v43, %v2479_v12  ;;  %v2637_v19 = vmul.f32 %v2062_v52, %v2479_v12  ;;  %v2640_v41 = vmul.f32 %v2063_v59, %v2479_v12  ;;  %v2067_v43 = vld [vmem:[#allocation2 + $0x1c0] sm:$0xff]  ;;  %v2072_v8 = vld [vmem:[#allocation2 + $0x1e8] sm:$0xff]  ;;  %v2073_v4 = vld [vmem:[#allocation2 + $0x1f0] sm:$0xff] }
 0x261   :  { %v2643_v9 = vmul.f32 %v2064_v3, %v2479_v12  ;;  %v2646_v20 = vmul.f32 %v2065_v11, %v2479_v12  ;;  %v2649_v38 = vmul.f32 %v2066_v29, %v2479_v12  ;;  %v2652_v52 = vmul.f32 %v2067_v43, %v2479_v12  ;;  %v2071_v15 = vld [vmem:[#allocation2 + $0x1e0] sm:$0xff] }
 0x262   :  { %v2655_v59 = vmul.f32 %v2068_v18, %v2479_v12  ;;  %v2658_v3 = vmul.f32 %v2069_v14, %v2479_v12  ;;  %v2661_v11 = vmul.f32 %v2070_v56, %v2479_v12  ;;  %v2664_v29 = vmul.f32 %v2071_v15, %v2479_v12 }
 0x263   :  { %v2667_v43 = vmul.f32 %v2072_v8, %v2479_v12  ;;  %v2670_v18 = vmul.f32 %v2073_v4, %v2479_v12 }
 0x264   :  { %2893 = vst [vmem:[#allocation17_spill] sm:$0xff] %v2655_v59  ;;  %2894 = vst [vmem:[#allocation18_spill] sm:$0xff] %v2658_v3  ;;  %v2074_v59 = vld [vmem:[#allocation2 + $0x1f8] sm:$0x3]  ;;  %v2075_v3 = vld [vmem:[#allocation2 + $0x200] sm:$0xff] }
 0x265   :  { %2895 = vst [vmem:[#allocation19_spill] sm:$0xff] %v2661_v11  ;;  %2896 = vst [vmem:[#allocation20_spill] sm:$0xff] %v2664_v29  ;;  %v2673_v14 = vmul.f32 %v2074_v59, %v2479_v12  ;;  %v2676_v56 = vmul.f32 %v2075_v3, %v2481_v13  ;;  %v2076_v11 = vld [vmem:[#allocation2 + $0x208] sm:$0xff]  ;;  %v2077_v29 = vld [vmem:[#allocation2 + $0x210] sm:$0xff] }
 0x266   :  { %2897 = vst [vmem:[#allocation21_spill] sm:$0xff] %v2667_v43  ;;  %2898 = vst [vmem:[#allocation22_spill] sm:$0xff] %v2670_v18  ;;  %v2679_v15 = vmul.f32 %v2076_v11, %v2481_v13  ;;  %v2682_v8 = vmul.f32 %v2077_v29, %v2481_v13  ;;  %v2078_v43 = vld [vmem:[#allocation2 + $0x218] sm:$0xff]  ;;  %v2079_v18 = vld [vmem:[#allocation2 + $0x220] sm:$0xff] }
 0x267   :  { %2899 = vst [vmem:[#allocation23_spill] sm:$0xff] %v2676_v56  ;;  %v2685_v4 = vmul.f32 %v2078_v43, %v2481_v13  ;;  %v2688_v12 = vmul.f32 %v2079_v18, %v2481_v13  ;;  %v2080_v59 = vld [vmem:[#allocation2 + $0x228] sm:$0xff]  ;;  %v2081_v56 = vld [vmem:[#allocation2 + $0x230] sm:$0xff] }
 0x268   :  { %2900 = vst [vmem:[#allocation24_spill] sm:$0xff] %v2679_v15  ;;  %2901 = vst [vmem:[#allocation25_spill] sm:$0xff] %v2682_v8  ;;  %v2691_v3 = vmul.f32 %v2080_v59, %v2481_v13  ;;  %v2694_v11 = vmul.f32 %v2081_v56, %v2481_v13  ;;  %v2082_v15 = vld [vmem:[#allocation2 + $0x238] sm:$0xff]  ;;  %v2083_v8 = vld [vmem:[#allocation2 + $0x240] sm:$0xff] }
 0x269   :  { %2902 = vst [vmem:[#allocation26_spill] sm:$0xff] %v2685_v4  ;;  %2903 = vst [vmem:[#allocation27_spill] sm:$0xff] %v2688_v12  ;;  %v2697_v29 = vmul.f32 %v2082_v15, %v2481_v13  ;;  %v2700_v43 = vmul.f32 %v2083_v8, %v2481_v13  ;;  %v2084_v4 = vld [vmem:[#allocation2 + $0x248] sm:$0xff]  ;;  %v2085_v12 = vld [vmem:[#allocation2 + $0x250] sm:$0xff] }
 0x26a   :  { %2904 = vst [vmem:[#allocation28_spill] sm:$0xff] %v2691_v3  ;;  %2905 = vst [vmem:[#allocation29_spill] sm:$0xff] %v2694_v11  ;;  %v2703_v18 = vmul.f32 %v2084_v4, %v2481_v13  ;;  %v2706_v59 = vmul.f32 %v2085_v12, %v2481_v13  ;;  %v2086_v3 = vld [vmem:[#allocation2 + $0x258] sm:$0xff]  ;;  %v2087_v11 = vld [vmem:[#allocation2 + $0x260] sm:$0xff] }
 0x26b   :  { %2906 = vst [vmem:[#allocation30_spill] sm:$0xff] %v2697_v29  ;;  %2907 = vst [vmem:[#allocation31_spill] sm:$0xff] %v2700_v43  ;;  %v2709_v56 = vmul.f32 %v2086_v3, %v2481_v13  ;;  %v2712_v15 = vmul.f32 %v2087_v11, %v2481_v13  ;;  %v2088_v29 = vld [vmem:[#allocation2 + $0x268] sm:$0xff]  ;;  %v2089_v43 = vld [vmem:[#allocation2 + $0x270] sm:$0xff] }
 0x26c   :  { %2908 = vst [vmem:[#allocation32_spill] sm:$0xff] %v2703_v18  ;;  %2909 = vst [vmem:[#allocation33_spill] sm:$0xff] %v2706_v59  ;;  %v2715_v8 = vmul.f32 %v2088_v29, %v2481_v13  ;;  %v2718_v4 = vmul.f32 %v2089_v43, %v2481_v13  ;;  %v2090_v18 = vld [vmem:[#allocation2 + $0x278] sm:$0xff]  ;;  %v2091_v59 = vld [vmem:[#allocation2 + $0x280] sm:$0xff] }
 0x26d   :  { %2910 = vst [vmem:[#allocation34_spill] sm:$0xff] %v2709_v56  ;;  %2911 = vst [vmem:[#allocation35_spill] sm:$0xff] %v2712_v15  ;;  %v2721_v12 = vmul.f32 %v2090_v18, %v2481_v13  ;;  %v2724_v3 = vmul.f32 %v2091_v59, %v2481_v13  ;;  %v2092_v56 = vld [vmem:[#allocation2 + $0x288] sm:$0xff]  ;;  %v2093_v15 = vld [vmem:[#allocation2 + $0x290] sm:$0xff] }
 0x26e   :  { %2912 = vst [vmem:[#allocation36_spill] sm:$0xff] %v2715_v8  ;;  %2913 = vst [vmem:[#allocation37_spill] sm:$0xff] %v2718_v4  ;;  %v2727_v11 = vmul.f32 %v2092_v56, %v2481_v13  ;;  %v2730_v29 = vmul.f32 %v2093_v15, %v2481_v13  ;;  %v2094_v8 = vld [vmem:[#allocation2 + $0x298] sm:$0xff]  ;;  %v2095_v4 = vld [vmem:[#allocation2 + $0x2a0] sm:$0xff] }
 0x26f   :  { %2914 = vst [vmem:[#allocation38_spill] sm:$0xff] %v2721_v12  ;;  %2915 = vst [vmem:[#allocation39_spill] sm:$0xff] %v2724_v3  ;;  %v2733_v43 = vmul.f32 %v2094_v8, %v2481_v13  ;;  %v2736_v18 = vmul.f32 %v2095_v4, %v2481_v13  ;;  %v2096_v12 = vld [vmem:[#allocation2 + $0x2a8] sm:$0xff]  ;;  %v2097_v3 = vld [vmem:[#allocation2 + $0x2b0] sm:$0xff] }
 0x270   :  { %2916 = vst [vmem:[#allocation40_spill] sm:$0xff] %v2727_v11  ;;  %2917 = vst [vmem:[#allocation41_spill] sm:$0xff] %v2730_v29  ;;  %v2739_v59 = vmul.f32 %v2096_v12, %v2481_v13  ;;  %v2742_v56 = vmul.f32 %v2097_v3, %v2481_v13  ;;  %v2098_v11 = vld [vmem:[#allocation2 + $0x2b8] sm:$0xff]  ;;  %v2099_v29 = vld [vmem:[#allocation2 + $0x2c0] sm:$0xff] }
 0x271   :  { %2918 = vst [vmem:[#allocation42_spill] sm:$0xff] %v2733_v43  ;;  %2919 = vst [vmem:[#allocation43_spill] sm:$0xff] %v2736_v18  ;;  %v2745_v15 = vmul.f32 %v2098_v11, %v2481_v13  ;;  %v2748_v8 = vmul.f32 %v2099_v29, %v2481_v13  ;;  %v2100_v43 = vld [vmem:[#allocation2 + $0x2c8] sm:$0xff]  ;;  %v2101_v18 = vld [vmem:[#allocation2 + $0x2d0] sm:$0xff] }
 0x272   :  { %2920 = vst [vmem:[#allocation44_spill] sm:$0xff] %v2739_v59  ;;  %2921 = vst [vmem:[#allocation45_spill] sm:$0xff] %v2742_v56  ;;  %v2751_v4 = vmul.f32 %v2100_v43, %v2481_v13  ;;  %v2754_v12 = vmul.f32 %v2101_v18, %v2481_v13  ;;  %v2102_v59 = vld [vmem:[#allocation2 + $0x2d8] sm:$0xff]  ;;  %v2103_v56 = vld [vmem:[#allocation2 + $0x2e0] sm:$0xff] }
 0x273   :  { %2922 = vst [vmem:[#allocation46_spill] sm:$0xff] %v2745_v15  ;;  %2923 = vst [vmem:[#allocation47_spill] sm:$0xff] %v2748_v8  ;;  %v2757_v3 = vmul.f32 %v2102_v59, %v2481_v13  ;;  %v2760_v11 = vmul.f32 %v2103_v56, %v2481_v13  ;;  %v2104_v15 = vld [vmem:[#allocation2 + $0x2e8] sm:$0xff]  ;;  %v2105_v8 = vld [vmem:[#allocation2 + $0x2f0] sm:$0xff]  ;;  %v1158_v59 = vadd.f32 %v2580_v23, %v2484_v36 }
 0x274   :  { %2924 = vst [vmem:[#allocation48_spill] sm:$0xff] %v2751_v4  ;;  %v2763_v29 = vmul.f32 %v2104_v15, %v2481_v13  ;;  %v2766_v43 = vmul.f32 %v2105_v8, %v2481_v13  ;;  %v2106_v4 = vld [vmem:[#allocation2 + $0x2f8] sm:$0x3]  ;;  %v1160_v56 = vadd.f32 %v2586_v32, %v2490_v55  ;;  %v1161_v15 = vadd.f32 %v2589_v34, %v2493_v22  ;;  %v2930_v34 = vld [vmem:[#allocation12_spill] sm:$0xff] }
 0x275   :  { %2925 = vst [vmem:[#allocation49_spill] sm:$0xff] %v2757_v3  ;;  %v2769_v18 = vmul.f32 %v2106_v4, %v2481_v13  ;;  %v1159_v3 = vadd.f32 %v2583_v31, %v2487_v17  ;;  %v1162_v8 = vadd.f32 %v2592_v37, %v2496_v25  ;;  %v1164_v13 = vadd.f32 %v2598_v44, %v2502_v28  ;;  %v2928_v31 = vld [vmem:[#allocation11_spill] sm:$0xff]  ;;  %v2946_v4 = vld [vmem:[#allocation30_spill] sm:$0xff] }
 0x276   :  { %2926 = vst [vmem:[#allocation50_spill] sm:$0xff] %v2766_v43  ;;  %v1163_v43 = vadd.f32 %v2595_v42, %v2499_v27  ;;  %v1165_v36 = vadd.f32 %v2601_v49, %v2505_v30  ;;  %v1166_v17 = vadd.f32 %v2604_v1, %v2508_v50  ;;  %v1167_v55 = vadd.f32 %v2607_v57, %v2511_v53  ;;  %v2932_v42 = vld [vmem:[#allocation13_spill] sm:$0xff]  ;;  %v2934_v49 = vld [vmem:[#allocation14_spill] sm:$0xff]  ;;  %v2936_v57 = vld [vmem:[#allocation15_spill] sm:$0xff] }
 0x277   :  { %v1168_v22 = vadd.f32 %v2610_v21, %v2514_v35  ;;  %v1169_v25 = vadd.f32 %v2613_v63, %v2517_v39  ;;  %v1170_v27 = vadd.f32 %v2616_v5, %v2520_v6  ;;  %v1171_v28 = vadd.f32 %v2619_v10, %v2523_v24  ;;  %v2938_v63 = vld [vmem:[#allocation16_spill] sm:$0xff]  ;;  %v2939_v5 = vld [vmem:[#allocation23_spill] sm:$0xff] }
 0x278   :  { %v1172_v30 = vadd.f32 %v2622_v16, %v2526_v47  ;;  %v1173_v50 = vadd.f32 %v2625_v26, %v2529_v45  ;;  %v1174_v53 = vadd.f32 %v2628_v33, %v2532_v48  ;;  %v1175_v35 = vadd.f32 %v2631_v40, %v2535_v51  ;;  %v2940_v10 = vld [vmem:[#allocation24_spill] sm:$0xff]  ;;  %v2941_v26 = vld [vmem:[#allocation25_spill] sm:$0xff]  ;;  %v2942_v40 = vld [vmem:[#allocation26_spill] sm:$0xff] }
 0x279   :  { %v1176_v39 = vadd.f32 %v2634_v46, %v2538_v7  ;;  %v1177_v6 = vadd.f32 %v2637_v19, %v2541_v54  ;;  %v1178_v24 = vadd.f32 %v2640_v41, %v2544_v0  ;;  %v1179_v47 = vadd.f32 %v2643_v9, %v2547_v58  ;;  %v2927_v7 = vld [vmem:[#allocation17_spill] sm:$0xff]  ;;  %v2929_v54 = vld [vmem:[#allocation18_spill] sm:$0xff]  ;;  %v2931_v0 = vld [vmem:[#allocation19_spill] sm:$0xff] }
 0x27a   :  { %v1180_v45 = vadd.f32 %v2646_v20, %v2550_v60  ;;  %v1181_v48 = vadd.f32 %v2649_v38, %v2553_v61  ;;  %v1182_v51 = vadd.f32 %v2652_v52, %v2556_v62  ;;  %v1183_v23 = vadd.f32 %v2927_v7, %v2559_v2  ;;  %v2933_v58 = vld [vmem:[#allocation20_spill] sm:$0xff]  ;;  %v2935_v60 = vld [vmem:[#allocation21_spill] sm:$0xff]  ;;  %v2937_v61 = vld [vmem:[#allocation22_spill] sm:$0xff] }
 0x27b   :  { %v1184_v32 = vadd.f32 %v2929_v54, %v2928_v31  ;;  %v1185_v37 = vadd.f32 %v2931_v0, %v2930_v34  ;;  %v1186_v44 = vadd.f32 %v2933_v58, %v2932_v42  ;;  %v1187_v1 = vadd.f32 %v2935_v60, %v2934_v49  ;;  %v2943_v19 = vld [vmem:[#allocation27_spill] sm:$0xff]  ;;  %v2944_v9 = vld [vmem:[#allocation28_spill] sm:$0xff]  ;;  %v2945_v38 = vld [vmem:[#allocation29_spill] sm:$0xff] }
 0x27c   :  { %v1188_v21 = vadd.f32 %v2937_v61, %v2936_v57  ;;  %v1189_v62 = vadd.f32 %v2673_v14, %v2938_v63  ;;  %v1227_v2 = vadd.f32 %v2939_v5, %v1158_v59  ;;  %v1228_v16 = vadd.f32 %v2940_v10, %v1159_v3  ;;  %v2947_v31 = vld [vmem:[#allocation31_spill] sm:$0xff]  ;;  %v2948_v34 = vld [vmem:[#allocation32_spill] sm:$0xff]  ;;  %v2949_v0 = vld [vmem:[#allocation33_spill] sm:$0xff] }
 0x27d   :  { %v1229_v33 = vadd.f32 %v2941_v26, %v1160_v56  ;;  %v1230_v46 = vadd.f32 %v2942_v40, %v1161_v15  ;;  %v1231_v41 = vadd.f32 %v2943_v19, %v1162_v8  ;;  %v1232_v20 = vadd.f32 %v2944_v9, %v1163_v43  ;;  %v2950_v42 = vld [vmem:[#allocation34_spill] sm:$0xff]  ;;  %v2951_v56 = vld [vmem:[#allocation35_spill] sm:$0xff]  ;;  %v2952_v8 = vld [vmem:[#allocation36_spill] sm:$0xff] }
 0x27e   :  { %v1233_v52 = vadd.f32 %v2945_v38, %v1164_v13  ;;  %v1234_v7 = vadd.f32 %v2946_v4, %v1165_v36  ;;  %v1235_v54 = vadd.f32 %v2947_v31, %v1166_v17  ;;  %v1236_v14 = vadd.f32 %v2948_v34, %v1167_v55  ;;  %1259 = vst [vmem:[#allocation7] sm:$0xff] %v1227_v2  ;;  %v2953_v58 = vld [vmem:[#allocation37_spill] sm:$0xff]  ;;  %v2954_v49 = vld [vmem:[#allocation38_spill] sm:$0xff]  ;;  %v2955_v17 = vld [vmem:[#allocation39_spill] sm:$0xff] }
 0x27f   :  { %v1237_v59 = vadd.f32 %v2949_v0, %v1168_v22  ;;  %v1238_v3 = vadd.f32 %v2950_v42, %v1169_v25  ;;  %1260 = vst [vmem:[#allocation7 + $0x8] sm:$0xff] %v1228_v16  ;;  %1261 = vst [vmem:[#allocation7 + $0x10] sm:$0xff] %v1229_v33  ;;  %v1239_v15 = vadd.f32 %v2951_v56, %v1170_v27  ;;  %v2956_v22 = vld [vmem:[#allocation40_spill] sm:$0xff]  ;;  %v2957_v60 = vld [vmem:[#allocation41_spill] sm:$0xff] }
 0x280   :  { %1262 = vst [vmem:[#allocation7 + $0x18] sm:$0xff] %v1230_v46  ;;  %v1240_v43 = vadd.f32 %v2952_v8, %v1171_v28  ;;  %v1241_v13 = vadd.f32 %v2953_v58, %v1172_v30  ;;  %v1242_v36 = vadd.f32 %v2954_v49, %v1173_v50  ;;  %1263 = vst [vmem:[#allocation7 + $0x20] sm:$0xff] %v1231_v41  ;;  %v2958_v61 = vld [vmem:[#allocation42_spill] sm:$0xff]  ;;  %v2959_v27 = vld [vmem:[#allocation43_spill] sm:$0xff] }
 0x281   :  { %1264 = vst [vmem:[#allocation7 + $0x28] sm:$0xff] %v1232_v20  ;;  %1265 = vst [vmem:[#allocation7 + $0x30] sm:$0xff] %v1233_v52  ;;  %v1243_v55 = vadd.f32 %v2955_v17, %v1174_v53  ;;  %v1244_v25 = vadd.f32 %v2956_v22, %v1175_v35  ;;  %v1245_v57 = vadd.f32 %v2957_v60, %v1176_v39  ;;  %v2960_v30 = vld [vmem:[#allocation44_spill] sm:$0xff]  ;;  %v2961_v5 = vld [vmem:[#allocation45_spill] sm:$0xff] }
 0x282   :  { %1266 = vst [vmem:[#allocation7 + $0x38] sm:$0xff] %v1234_v7  ;;  %v1246_v63 = vadd.f32 %v2958_v61, %v1177_v6  ;;  %1267 = vst [vmem:[#allocation7 + $0x40] sm:$0xff] %v1235_v54  ;;  %v1247_v28 = vadd.f32 %v2959_v27, %v1178_v24  ;;  %v1248_v50 = vadd.f32 %v2960_v30, %v1179_v47  ;;  %v2962_v10 = vld [vmem:[#allocation46_spill] sm:$0xff]  ;;  %v2963_v35 = vld [vmem:[#allocation47_spill] sm:$0xff] }
 0x283   :  { %1268 = vst [vmem:[#allocation7 + $0x48] sm:$0xff] %v1236_v14  ;;  %1269 = vst [vmem:[#allocation7 + $0x50] sm:$0xff] %v1237_v59  ;;  %v1249_v2 = vadd.f32 %v2961_v5, %v1180_v45  ;;  %v1250_v53 = vadd.f32 %v2962_v10, %v1181_v48  ;;  %v1251_v39 = vadd.f32 %v2963_v35, %v1182_v51  ;;  %v2964_v6 = vld [vmem:[#allocation48_spill] sm:$0xff]  ;;  %v2965_v33 = vld [vmem:[#allocation49_spill] sm:$0xff] }
 0x284   :  { %1270 = vst [vmem:[#allocation7 + $0x58] sm:$0xff] %v1238_v3  ;;  %1271 = vst [vmem:[#allocation7 + $0x60] sm:$0xff] %v1239_v15  ;;  %v1252_v16 = vadd.f32 %v2964_v6, %v1183_v23  ;;  %v1253_v26 = vadd.f32 %v2754_v12, %v1184_v32  ;;  %v1254_v40 = vadd.f32 %v2965_v33, %v1185_v37  ;;  %v2966_v45 = vld [vmem:[#allocation50_spill] sm:$0xff] }
 0x285   :  { %1272 = vst [vmem:[#allocation7 + $0x68] sm:$0xff] %v1240_v43  ;;  %1273 = vst [vmem:[#allocation7 + $0x70] sm:$0xff] %v1241_v13  ;;  %v1255_v24 = vadd.f32 %v2760_v11, %v1186_v44  ;;  %v1256_v47 = vadd.f32 %v2763_v29, %v1187_v1  ;;  %v1257_v48 = vadd.f32 %v2966_v45, %v1188_v21 }
 0x286   :  { %1274 = vst [vmem:[#allocation7 + $0x78] sm:$0xff] %v1242_v36  ;;  %1275 = vst [vmem:[#allocation7 + $0x80] sm:$0xff] %v1243_v55  ;;  %v1258_v46 = vadd.f32 %v2769_v18, %v1189_v62 }
 0x287   :  { %1276 = vst [vmem:[#allocation7 + $0x88] sm:$0xff] %v1244_v25  ;;  %1277 = vst [vmem:[#allocation7 + $0x90] sm:$0xff] %v1245_v57 }
 0x288   :  { %1278 = vst [vmem:[#allocation7 + $0x98] sm:$0xff] %v1246_v63  ;;  %1279 = vst [vmem:[#allocation7 + $0xa0] sm:$0xff] %v1247_v28 }
 0x289   :  { %1280 = vst [vmem:[#allocation7 + $0xa8] sm:$0xff] %v1248_v50  ;;  %1281 = vst [vmem:[#allocation7 + $0xb0] sm:$0xff] %v1249_v2 }
 0x28a   :  { %1282 = vst [vmem:[#allocation7 + $0xb8] sm:$0xff] %v1250_v53  ;;  %1283 = vst [vmem:[#allocation7 + $0xc0] sm:$0xff] %v1251_v39 }
 0x28b   :  { %1284 = vst [vmem:[#allocation7 + $0xc8] sm:$0xff] %v1252_v16  ;;  %1285 = vst [vmem:[#allocation7 + $0xd0] sm:$0xff] %v1253_v26 }
 0x28c   :  { %1286 = vst [vmem:[#allocation7 + $0xd8] sm:$0xff] %v1254_v40  ;;  %1287 = vst [vmem:[#allocation7 + $0xe0] sm:$0xff] %v1255_v24 }
 0x28d   :  { %1288 = vst [vmem:[#allocation7 + $0xe8] sm:$0xff] %v1256_v47  ;;  %1289 = vst [vmem:[#allocation7 + $0xf0] sm:$0xff] %v1257_v48 }
 0x28e   :  { %1290 = vst [vmem:[#allocation7 + $0xf8] sm:$0x3] %v1258_v46 }
 0x28f   :  { %2162 = shalt.err (!%p2159_p6)
}
 0x290   :  { %s2163_s20 = scalar_lea.hbm %s2886_s4, 4096 }
 0x291   :  { %p2164_p7 = scmp.ne.s32.totalorder %s2886_s4, %s2163_s20  ;;  %p2167_p8 = scmp.lt.u32.totalorder %s2163_s20, %s2886_s4 }
 0x293   :  { %p2169_p9 = pnand %p2167_p8, %p2164_p7 }
 0x295   :  { %2172 = shalt.err (!%p2169_p9)
}
 0x296   :  { %1302 = dma.vmem_to_hbm [thread:$0]  %s1297_s16, 4096, %s2886_s4, [#allocation4], %s2180_s25, %s2180_s25, %s2181_s26  }
 0x297   :  { %2177 = dma.done.wait [#allocation4], 4096  }
 0x298   :  { %2178 = vsyncadd [#allocation4], 4294963200 }
 0x299   :  { %1306 = vsyncpa [#allocation3], 1 }
 0x29a   :  { %1307 = vsyncpa [#allocation6], 1 }
 0x29b   :  { %1308 = vsyncpa [#allocation4], 1 }

</bundles_post_ra>
